<compile_context>
chip_gen: v6e
topology: v6e:2x2x1
jax: 0.10.0
libtpu: 0.0.40
codegen_flags: <defaults>
</compile_context>

<pallas_src>
import functools
import math

import numpy as np
import jax
import jax.numpy as jnp
from jax.experimental import pallas as pl
from jax.experimental.pallas import tpu as pltpu


# ---------------------------------------------------------------------------
# Fused Pallas kernel
# ---------------------------------------------------------------------------

def _fused_mha_kernel(q_ref, k_ref, v_ref, w_ref, b_ref, place_ref, am_ref,
                      o_ref, qf_ref, kf_ref, vf_ref, *,
                      batch, heads, s_q, s_k, s_v):
    # q_ref: (b, s_q, e)  k_ref: (b, s_k, e)  v_ref: (b, s_v, e)
    # w_ref: (3*heads, e, d)   stacked per-head weight column blocks [Q.., K.., V..]
    # b_ref: (3*heads, 1, d)   matching bias slices (scale folded into the Q entries)
    # place_ref: (heads, d, e) constant 0/1 placement matrices
    # am_ref: (heads*s_q, heads*s_k) additive mask (0 / -1e30)
    # o_ref: (b, s_q, e)
    # qf/kf/vf_ref: VMEM scratch, (heads*s_*, d)
    for bi in range(batch):            # static unroll, batch is tiny
        xq = q_ref[bi]                 # (s_q, e)
        xk = k_ref[bi]                 # (s_k, e)
        xv = v_ref[bi]                 # (s_v, e)

        # Fused Q/K/V projections, emitted straight into the flat (heads*s, d) layout:
        #   qf[m*s + t, :] = (x @ Wq^T + bq)[t, m*d:(m+1)*d]
        # Per-head weight column blocks were pre-split at init, so this is just `heads`
        # small MXU matmuls per tensor plus 8-sublane-aligned slab stores -- no in-kernel
        # lane regrouping.
        for m in range(heads):
            qf_ref[m * s_q:(m + 1) * s_q, :] = (
                jnp.dot(xq, w_ref[0 * heads + m],
                        preferred_element_type=jnp.float32) + b_ref[0 * heads + m])
            kf_ref[m * s_k:(m + 1) * s_k, :] = (
                jnp.dot(xk, w_ref[1 * heads + m],
                        preferred_element_type=jnp.float32) + b_ref[1 * heads + m])
            vf_ref[m * s_v:(m + 1) * s_v, :] = (
                jnp.dot(xv, w_ref[2 * heads + m],
                        preferred_element_type=jnp.float32) + b_ref[2 * heads + m])

        qf = qf_ref[...]               # (heads*s_q, d)
        kf = kf_ref[...]               # (heads*s_k, d)
        vf = vf_ref[...]               # (heads*s_v, d)

        # One Gram matrix over all (head, position) pairs; the additive mask (-1e30 off the
        # per-head blocks and where the user mask hits) restricts the softmax to exactly the
        # per-head scores of the PyTorch view.  1/sqrt(d) is already folded into Wq/bq.
        scores = jnp.einsum("pd,qd->pq", qf, kf,
                            preferred_element_type=jnp.float32) + am_ref[...]

        m_row = jnp.max(scores, axis=-1, keepdims=True)
        p = jnp.exp(scores - m_row)                    # masked entries underflow to exactly 0
        denom = jnp.sum(p, axis=-1, keepdims=True)
        inv = pl.reciprocal(denom, approx=True)        # EUP slot (free vs. VPU divide)
        inv = inv * (2.0 - denom * inv)                # one Newton step -> f32-accurate
        probs = p * inv

        ob = jnp.dot(probs, vf, preferred_element_type=jnp.float32)   # (heads*s_q, d)

        # (heads*s_q, d) -> (s_q, e): output column-block m of row t is exactly row
        # m*s_q + t of `ob`.  Placement via constant 0/1 selection matrices on the
        # otherwise-idle MXU (no lane concat / reshape needed).
        out_mat = jnp.dot(ob[0:s_q, :], place_ref[0],
                          preferred_element_type=jnp.float32)
        for m in range(1, heads):
            out_mat = out_mat + jnp.dot(ob[m * s_q:(m + 1) * s_q, :], place_ref[m],
                                        preferred_element_type=jnp.float32)
        o_ref[bi] = out_mat


# ---------------------------------------------------------------------------
# Init-time parameter prep (runs once, NOT per forward call)
# ---------------------------------------------------------------------------

def prepare_mha_params(params, heads):
    wq = jnp.asarray(params["wq"], jnp.float32)   # PyTorch layout (out, in)
    wk = jnp.asarray(params["wk"], jnp.float32)
    wv = jnp.asarray(params["wv"], jnp.float32)
    bq = jnp.asarray(params["bq"], jnp.float32)
    bk = jnp.asarray(params["bk"], jnp.float32)
    bv = jnp.asarray(params["bv"], jnp.float32)

    e = wq.shape[0]
    assert e % heads == 0
    d = e // heads
    scale = 1.0 / math.sqrt(d)

    # y = x @ W^T + b ; fold the 1/sqrt(d) attention scale into the Q projection.
    wqT = wq.T * scale
    wkT = wk.T
    wvT = wv.T
    bq = bq * scale

    w_blocks, b_blocks = [], []
    for wT, bb in ((wqT, bq), (wkT, bk), (wvT, bv)):
        for m in range(heads):
            w_blocks.append(wT[:, m * d:(m + 1) * d])
            b_blocks.append(bb[m * d:(m + 1) * d].reshape(1, d))
    w_split = jnp.stack(w_blocks)                  # (3*heads, e, d)
    b_split = jnp.stack(b_blocks)                  # (3*heads, 1, d)

    # Constant placement matrices: place[m] puts a (s, d) block into output lanes [m*d,(m+1)*d).
    place = np.zeros((heads, d, e), np.float32)
    for m in range(heads):
        place[m, :, m * d:(m + 1) * d] = np.eye(d, dtype=np.float32)

    return {"w": w_split, "b": b_split, "place": jnp.asarray(place)}


# ---------------------------------------------------------------------------
# Forward wrapper (single fused pallas_call)
# ---------------------------------------------------------------------------

def mha_forward(q, k, v, w_split, b_split, place, mask=None):
    b, s_q, e = q.shape
    _, s_k, _ = k.shape
    _, s_v, _ = v.shape
    heads = w_split.shape[0] // 3
    d = w_split.shape[2]
    assert heads * d == e and s_k == s_v
    assert s_q % heads == 0 and s_k % heads == 0   # TODO(synk): general head split unsupported

    r_q, r_k = s_q // heads, s_k // heads
    P_q, P_k = heads * s_q, heads * s_k

    # Static (trace-time) index maps of the raw .view(b, heads, s, d) head split.
    p1 = np.arange(P_q)
    m1, pos1 = p1 // s_q, p1 % s_q
    hq = pos1 // r_q                               # which head a flat-Q row belongs to
    tq = (pos1 % r_q) * heads + m1                 # its within-head (quirky-view) position
    p2 = np.arange(P_k)
    m2, pos2 = p2 // s_k, p2 % s_k
    hk = pos2 // r_k
    uk = (pos2 % r_k) * heads + m2
    valid = hq[:, None] == hk[None, :]             # same-head blocks only

    if mask is None:
        allowed = jnp.asarray(valid)
    else:
        user = jnp.asarray(mask).astype(bool)[tq][:, uk]   # user mask permuted to flat layout
        allowed = jnp.asarray(valid) & jnp.logical_not(user)
    # Large finite negative instead of -inf (avoids NaNs for fully-masked rows).
    add_mask = jnp.where(allowed, jnp.float32(0.0), jnp.float32(-1e30))

    kernel = functools.partial(_fused_mha_kernel, batch=b, heads=heads,
                               s_q=s_q, s_k=s_k, s_v=s_v)

    out = pl.pallas_call(
        kernel,
        out_shape=jax.ShapeDtypeStruct((b, s_q, e), jnp.float32),
        grid=(1,),                                  # collapsed batch: single grid step
        in_specs=[
            pl.BlockSpec((b, s_q, e), lambda i: (0, 0, 0)),
            pl.BlockSpec((b, s_k, e), lambda i: (0, 0, 0)),
            pl.BlockSpec((b, s_v, e), lambda i: (0, 0, 0)),
            pl.BlockSpec((3 * heads, e, d), lambda i: (0, 0, 0)),
            pl.BlockSpec((3 * heads, 1, d), lambda i: (0, 0, 0)),
            pl.BlockSpec((heads, d, e), lambda i: (0, 0, 0)),
            pl.BlockSpec((P_q, P_k), lambda i: (0, 0)),
        ],
        out_specs=pl.BlockSpec((b, s_q, e), lambda i: (0, 0, 0)),
        scratch_shapes=[
            pltpu.VMEM((P_q, d), jnp.float32),
            pltpu.VMEM((P_k, d), jnp.float32),
            pltpu.VMEM((heads * s_v, d), jnp.float32),
        ],
        compiler_params=pltpu.CompilerParams(dimension_semantics=("arbitrary",)),
    )(q, k, v, w_split, b_split, place, add_mask)

    # Dropout is identity in eval mode.  Output is already (b, s_q, e) -- lane dense.
    return out


mha_forward_jit = jax.jit(mha_forward)


# ---------------------------------------------------------------------------
# Pure-JAX reference (mirrors the PyTorch forward, incl. the raw .view head split)
# ---------------------------------------------------------------------------

def reference_mha(q, k, v, params, heads, mask=None):
    b, s_q, e = q.shape
    _, s_k, _ = k.shape
    d = e // heads
    lin = lambda x, w, bb: x @ w.T + bb
    K = lin(k, params["wk"], params["bk"]).reshape(b, heads, s_k, d)
    Q = lin(q, params["wq"], params["bq"]).reshape(b, heads, s_q, d)
    V = lin(v, params["wv"], params["bv"]).reshape(b, heads, -1, d)
    scores = jnp.einsum("bhqd,bhkd->bhqk", Q, K) / math.sqrt(d)
    if mask is not None:
        scores = jnp.where(mask[None, None], -jnp.inf, scores)
    attn = jax.nn.softmax(scores, axis=-1)
    out = jnp.einsum("bhqk,bhkd->bhqd", attn, V)
    return out.reshape(b, s_q, heads * d)


# ---------------------------------------------------------------------------
# Main
# ---------------------------------------------------------------------------

if __name__ == "__main__":
    # Config-equivalent hyperparameters: embedding_dims=32, heads=4.
    batch, seq, embed, heads = 2, 8, 32, 4

    key = jax.random.PRNGKey(0)
    kq, kk, kv, kwq, kwk, kwv, kbq, kbk, kbv = jax.random.split(key, 9)

    q = jax.random.normal(kq, (batch, seq, embed), jnp.float32)
    k = jax.random.normal(kk, (batch, seq, embed), jnp.float32)
    v = jax.random.normal(kv, (batch, seq, embed), jnp.float32)

    lim = 1.0 / math.sqrt(embed)
    params = {
        "wq": jax.random.uniform(kwq, (embed, embed), jnp.float32, -lim, lim),
        "wk": jax.random.uniform(kwk, (embed, embed), jnp.float32, -lim, lim),
        "wv": jax.random.uniform(kwv, (embed, embed), jnp.float32, -lim, lim),
        "bq": jax.random.uniform(kbq, (embed,), jnp.float32, -lim, lim),
        "bk": jax.random.uniform(kbk, (embed,), jnp.float32, -lim, lim),
        "bv": jax.random.uniform(kbv, (embed,), jnp.float32, -lim, lim),
    }

    # Causal mask: True above the diagonal -> masked.
    mask = jnp.triu(jnp.ones((seq, seq), jnp.bool_), k=1)

    prep = prepare_mha_params(params, heads)        # init-time weight prep (runs once)

    out = mha_forward_jit(q, k, v, prep["w"], prep["b"], prep["place"], mask)
    out = jax.block_until_ready(out)

    ref = reference_mha(q, k, v, params, heads, mask=mask)
    assert out.shape == (batch, seq, embed)
    assert jnp.allclose(out, ref, atol=1e-3, rtol=1e-3), (
        float(jnp.max(jnp.abs(out - ref))))

    print("KERNEL_OK")
</pallas_src>

<mosaic_0001>
module attributes {stable_mosaic.version = 11 : i64} {
  func.func @_fused_mha_kernel(%arg0: i32, %arg1: memref<2x8x32xf32, #tpu.memory_space<vmem>>, %arg2: memref<2x8x32xf32, #tpu.memory_space<vmem>>, %arg3: memref<2x8x32xf32, #tpu.memory_space<vmem>>, %arg4: memref<12x32x8xf32, #tpu.memory_space<vmem>>, %arg5: memref<12x1x8xf32, #tpu.memory_space<vmem>>, %arg6: memref<4x8x32xf32, #tpu.memory_space<vmem>>, %arg7: memref<32x32xf32, #tpu.memory_space<vmem>>, %arg8: memref<2x8x32xf32, #tpu.memory_space<vmem>>, %arg9: memref<32x8xf32, #tpu.memory_space<vmem>>, %arg10: memref<32x8xf32, #tpu.memory_space<vmem>>, %arg11: memref<32x8xf32, #tpu.memory_space<vmem>>) attributes {dimension_semantics = [#tpu.dimension_semantics<arbitrary>], iteration_bounds = array<i64: 1>, scalar_prefetch = 0 : i64, scratch_operands = 3 : i64, tpu.core_type = #tpu.core_type<tc>, window_params = [{pipeline_mode = #tpu.pipeline_mode<synchronous>, transform_indices = @transform_0, window_bounds = array<i64: 2, 8, 32>}, {pipeline_mode = #tpu.pipeline_mode<synchronous>, transform_indices = @transform_1, window_bounds = array<i64: 2, 8, 32>}, {pipeline_mode = #tpu.pipeline_mode<synchronous>, transform_indices = @transform_2, window_bounds = array<i64: 2, 8, 32>}, {pipeline_mode = #tpu.pipeline_mode<synchronous>, transform_indices = @transform_3, window_bounds = array<i64: 12, 32, 8>}, {pipeline_mode = #tpu.pipeline_mode<synchronous>, transform_indices = @transform_4, window_bounds = array<i64: 12, 1, 8>}, {pipeline_mode = #tpu.pipeline_mode<synchronous>, transform_indices = @transform_5, window_bounds = array<i64: 4, 8, 32>}, {pipeline_mode = #tpu.pipeline_mode<synchronous>, transform_indices = @transform_6, window_bounds = array<i64: 32, 32>}, {pipeline_mode = #tpu.pipeline_mode<synchronous>, transform_indices = @transform_7, window_bounds = array<i64: 2, 8, 32>}]} {
    %c0 = arith.constant 0 : index
    %c0_0 = arith.constant 0 : index
    %c0_1 = arith.constant 0 : index
    %0 = vector.load %arg1[%c0, %c0_0, %c0_1] : memref<2x8x32xf32, #tpu.memory_space<vmem>>, vector<1x8x32xf32>
    %1 = vector.shape_cast %0 : vector<1x8x32xf32> to vector<8x32xf32>
    %c0_2 = arith.constant 0 : index
    %c0_3 = arith.constant 0 : index
    %c0_4 = arith.constant 0 : index
    %2 = vector.load %arg2[%c0_2, %c0_3, %c0_4] : memref<2x8x32xf32, #tpu.memory_space<vmem>>, vector<1x8x32xf32>
    %3 = vector.shape_cast %2 : vector<1x8x32xf32> to vector<8x32xf32>
    %c0_5 = arith.constant 0 : index
    %c0_6 = arith.constant 0 : index
    %c0_7 = arith.constant 0 : index
    %4 = vector.load %arg3[%c0_5, %c0_6, %c0_7] : memref<2x8x32xf32, #tpu.memory_space<vmem>>, vector<1x8x32xf32>
    %5 = vector.shape_cast %4 : vector<1x8x32xf32> to vector<8x32xf32>
    %c0_8 = arith.constant 0 : index
    %c0_9 = arith.constant 0 : index
    %c0_10 = arith.constant 0 : index
    %6 = vector.load %arg4[%c0_8, %c0_9, %c0_10] : memref<12x32x8xf32, #tpu.memory_space<vmem>>, vector<1x32x8xf32>
    %7 = vector.shape_cast %6 : vector<1x32x8xf32> to vector<32x8xf32>
    %cst = arith.constant dense<0.000000e+00> : vector<8x8xf32>
    %8 = tpu.matmul %1, %7, %cst {dimension_numbers = #tpu.dot_dimension_numbers<[1], [0], [0], [1], [0, 0, 1, 1], [], []>} : vector<8x32xf32>, vector<32x8xf32>, vector<8x8xf32> -> vector<8x8xf32>
    %c0_11 = arith.constant 0 : index
    %c0_12 = arith.constant 0 : index
    %c0_13 = arith.constant 0 : index
    %9 = vector.load %arg5[%c0_11, %c0_12, %c0_13] : memref<12x1x8xf32, #tpu.memory_space<vmem>>, vector<1x1x8xf32>
    %10 = vector.shape_cast %9 : vector<1x1x8xf32> to vector<1x8xf32>
    %11 = vector.broadcast %10 : vector<1x8xf32> to vector<8x8xf32>
    %12 = arith.addf %8, %11 : vector<8x8xf32>
    %c0_14 = arith.constant 0 : index
    %c0_15 = arith.constant 0 : index
    %13 = vector.load %arg9[%c0_14, %c0_15] : memref<32x8xf32, #tpu.memory_space<vmem>>, vector<8x8xf32>
    tpu.vector_store %arg9[%c0_14, %c0_15], %12 {strides = array<i32>} : memref<32x8xf32, #tpu.memory_space<vmem>>, vector<8x8xf32>,
    %c4 = arith.constant 4 : index
    %c0_16 = arith.constant 0 : index
    %c0_17 = arith.constant 0 : index
    %14 = vector.load %arg4[%c4, %c0_16, %c0_17] : memref<12x32x8xf32, #tpu.memory_space<vmem>>, vector<1x32x8xf32>
    %15 = vector.shape_cast %14 : vector<1x32x8xf32> to vector<32x8xf32>
    %cst_18 = arith.constant dense<0.000000e+00> : vector<8x8xf32>
    %16 = tpu.matmul %3, %15, %cst_18 {dimension_numbers = #tpu.dot_dimension_numbers<[1], [0], [0], [1], [0, 0, 1, 1], [], []>} : vector<8x32xf32>, vector<32x8xf32>, vector<8x8xf32> -> vector<8x8xf32>
    %c4_19 = arith.constant 4 : index
    %c0_20 = arith.constant 0 : index
    %c0_21 = arith.constant 0 : index
    %17 = vector.load %arg5[%c4_19, %c0_20, %c0_21] : memref<12x1x8xf32, #tpu.memory_space<vmem>>, vector<1x1x8xf32>
    %18 = vector.shape_cast %17 : vector<1x1x8xf32> to vector<1x8xf32>
    %19 = vector.broadcast %18 : vector<1x8xf32> to vector<8x8xf32>
    %20 = arith.addf %16, %19 : vector<8x8xf32>
    %c0_22 = arith.constant 0 : index
    %c0_23 = arith.constant 0 : index
    %21 = vector.load %arg10[%c0_22, %c0_23] : memref<32x8xf32, #tpu.memory_space<vmem>>, vector<8x8xf32>
    tpu.vector_store %arg10[%c0_22, %c0_23], %20 {strides = array<i32>} : memref<32x8xf32, #tpu.memory_space<vmem>>, vector<8x8xf32>,
    %c8 = arith.constant 8 : index
    %c0_24 = arith.constant 0 : index
    %c0_25 = arith.constant 0 : index
    %22 = vector.load %arg4[%c8, %c0_24, %c0_25] : memref<12x32x8xf32, #tpu.memory_space<vmem>>, vector<1x32x8xf32>
    %23 = vector.shape_cast %22 : vector<1x32x8xf32> to vector<32x8xf32>
    %cst_26 = arith.constant dense<0.000000e+00> : vector<8x8xf32>
    %24 = tpu.matmul %5, %23, %cst_26 {dimension_numbers = #tpu.dot_dimension_numbers<[1], [0], [0], [1], [0, 0, 1, 1], [], []>} : vector<8x32xf32>, vector<32x8xf32>, vector<8x8xf32> -> vector<8x8xf32>
    %c8_27 = arith.constant 8 : index
    %c0_28 = arith.constant 0 : index
    %c0_29 = arith.constant 0 : index
    %25 = vector.load %arg5[%c8_27, %c0_28, %c0_29] : memref<12x1x8xf32, #tpu.memory_space<vmem>>, vector<1x1x8xf32>
    %26 = vector.shape_cast %25 : vector<1x1x8xf32> to vector<1x8xf32>
    %27 = vector.broadcast %26 : vector<1x8xf32> to vector<8x8xf32>
    %28 = arith.addf %24, %27 : vector<8x8xf32>
    %c0_30 = arith.constant 0 : index
    %c0_31 = arith.constant 0 : index
    %29 = vector.load %arg11[%c0_30, %c0_31] : memref<32x8xf32, #tpu.memory_space<vmem>>, vector<8x8xf32>
    tpu.vector_store %arg11[%c0_30, %c0_31], %28 {strides = array<i32>} : memref<32x8xf32, #tpu.memory_space<vmem>>, vector<8x8xf32>,
    %c1 = arith.constant 1 : index
    %c0_32 = arith.constant 0 : index
    %c0_33 = arith.constant 0 : index
    %30 = vector.load %arg4[%c1, %c0_32, %c0_33] : memref<12x32x8xf32, #tpu.memory_space<vmem>>, vector<1x32x8xf32>
    %31 = vector.shape_cast %30 : vector<1x32x8xf32> to vector<32x8xf32>
    %cst_34 = arith.constant dense<0.000000e+00> : vector<8x8xf32>
    %32 = tpu.matmul %1, %31, %cst_34 {dimension_numbers = #tpu.dot_dimension_numbers<[1], [0], [0], [1], [0, 0, 1, 1], [], []>} : vector<8x32xf32>, vector<32x8xf32>, vector<8x8xf32> -> vector<8x8xf32>
    %c1_35 = arith.constant 1 : index
    %c0_36 = arith.constant 0 : index
    %c0_37 = arith.constant 0 : index
    %33 = vector.load %arg5[%c1_35, %c0_36, %c0_37] : memref<12x1x8xf32, #tpu.memory_space<vmem>>, vector<1x1x8xf32>
    %34 = vector.shape_cast %33 : vector<1x1x8xf32> to vector<1x8xf32>
    %35 = vector.broadcast %34 : vector<1x8xf32> to vector<8x8xf32>
    %36 = arith.addf %32, %35 : vector<8x8xf32>
    %c8_38 = arith.constant 8 : index
    %c0_39 = arith.constant 0 : index
    %37 = vector.load %arg9[%c8_38, %c0_39] : memref<32x8xf32, #tpu.memory_space<vmem>>, vector<8x8xf32>
    tpu.vector_store %arg9[%c8_38, %c0_39], %36 {strides = array<i32>} : memref<32x8xf32, #tpu.memory_space<vmem>>, vector<8x8xf32>,
    %c5 = arith.constant 5 : index
    %c0_40 = arith.constant 0 : index
    %c0_41 = arith.constant 0 : index
    %38 = vector.load %arg4[%c5, %c0_40, %c0_41] : memref<12x32x8xf32, #tpu.memory_space<vmem>>, vector<1x32x8xf32>
    %39 = vector.shape_cast %38 : vector<1x32x8xf32> to vector<32x8xf32>
    %cst_42 = arith.constant dense<0.000000e+00> : vector<8x8xf32>
    %40 = tpu.matmul %3, %39, %cst_42 {dimension_numbers = #tpu.dot_dimension_numbers<[1], [0], [0], [1], [0, 0, 1, 1], [], []>} : vector<8x32xf32>, vector<32x8xf32>, vector<8x8xf32> -> vector<8x8xf32>
    %c5_43 = arith.constant 5 : index
    %c0_44 = arith.constant 0 : index
    %c0_45 = arith.constant 0 : index
    %41 = vector.load %arg5[%c5_43, %c0_44, %c0_45] : memref<12x1x8xf32, #tpu.memory_space<vmem>>, vector<1x1x8xf32>
    %42 = vector.shape_cast %41 : vector<1x1x8xf32> to vector<1x8xf32>
    %43 = vector.broadcast %42 : vector<1x8xf32> to vector<8x8xf32>
    %44 = arith.addf %40, %43 : vector<8x8xf32>
    %c8_46 = arith.constant 8 : index
    %c0_47 = arith.constant 0 : index
    %45 = vector.load %arg10[%c8_46, %c0_47] : memref<32x8xf32, #tpu.memory_space<vmem>>, vector<8x8xf32>
    tpu.vector_store %arg10[%c8_46, %c0_47], %44 {strides = array<i32>} : memref<32x8xf32, #tpu.memory_space<vmem>>, vector<8x8xf32>,
    %c9 = arith.constant 9 : index
    %c0_48 = arith.constant 0 : index
    %c0_49 = arith.constant 0 : index
    %46 = vector.load %arg4[%c9, %c0_48, %c0_49] : memref<12x32x8xf32, #tpu.memory_space<vmem>>, vector<1x32x8xf32>
    %47 = vector.shape_cast %46 : vector<1x32x8xf32> to vector<32x8xf32>
    %cst_50 = arith.constant dense<0.000000e+00> : vector<8x8xf32>
    %48 = tpu.matmul %5, %47, %cst_50 {dimension_numbers = #tpu.dot_dimension_numbers<[1], [0], [0], [1], [0, 0, 1, 1], [], []>} : vector<8x32xf32>, vector<32x8xf32>, vector<8x8xf32> -> vector<8x8xf32>
    %c9_51 = arith.constant 9 : index
    %c0_52 = arith.constant 0 : index
    %c0_53 = arith.constant 0 : index
    %49 = vector.load %arg5[%c9_51, %c0_52, %c0_53] : memref<12x1x8xf32, #tpu.memory_space<vmem>>, vector<1x1x8xf32>
    %50 = vector.shape_cast %49 : vector<1x1x8xf32> to vector<1x8xf32>
    %51 = vector.broadcast %50 : vector<1x8xf32> to vector<8x8xf32>
    %52 = arith.addf %48, %51 : vector<8x8xf32>
    %c8_54 = arith.constant 8 : index
    %c0_55 = arith.constant 0 : index
    %53 = vector.load %arg11[%c8_54, %c0_55] : memref<32x8xf32, #tpu.memory_space<vmem>>, vector<8x8xf32>
    tpu.vector_store %arg11[%c8_54, %c0_55], %52 {strides = array<i32>} : memref<32x8xf32, #tpu.memory_space<vmem>>, vector<8x8xf32>,
    %c2 = arith.constant 2 : index
    %c0_56 = arith.constant 0 : index
    %c0_57 = arith.constant 0 : index
    %54 = vector.load %arg4[%c2, %c0_56, %c0_57] : memref<12x32x8xf32, #tpu.memory_space<vmem>>, vector<1x32x8xf32>
    %55 = vector.shape_cast %54 : vector<1x32x8xf32> to vector<32x8xf32>
    %cst_58 = arith.constant dense<0.000000e+00> : vector<8x8xf32>
    %56 = tpu.matmul %1, %55, %cst_58 {dimension_numbers = #tpu.dot_dimension_numbers<[1], [0], [0], [1], [0, 0, 1, 1], [], []>} : vector<8x32xf32>, vector<32x8xf32>, vector<8x8xf32> -> vector<8x8xf32>
    %c2_59 = arith.constant 2 : index
    %c0_60 = arith.constant 0 : index
    %c0_61 = arith.constant 0 : index
    %57 = vector.load %arg5[%c2_59, %c0_60, %c0_61] : memref<12x1x8xf32, #tpu.memory_space<vmem>>, vector<1x1x8xf32>
    %58 = vector.shape_cast %57 : vector<1x1x8xf32> to vector<1x8xf32>
    %59 = vector.broadcast %58 : vector<1x8xf32> to vector<8x8xf32>
    %60 = arith.addf %56, %59 : vector<8x8xf32>
    %c16 = arith.constant 16 : index
    %c0_62 = arith.constant 0 : index
    %61 = vector.load %arg9[%c16, %c0_62] : memref<32x8xf32, #tpu.memory_space<vmem>>, vector<8x8xf32>
    tpu.vector_store %arg9[%c16, %c0_62], %60 {strides = array<i32>} : memref<32x8xf32, #tpu.memory_space<vmem>>, vector<8x8xf32>,
    %c6 = arith.constant 6 : index
    %c0_63 = arith.constant 0 : index
    %c0_64 = arith.constant 0 : index
    %62 = vector.load %arg4[%c6, %c0_63, %c0_64] : memref<12x32x8xf32, #tpu.memory_space<vmem>>, vector<1x32x8xf32>
    %63 = vector.shape_cast %62 : vector<1x32x8xf32> to vector<32x8xf32>
    %cst_65 = arith.constant dense<0.000000e+00> : vector<8x8xf32>
    %64 = tpu.matmul %3, %63, %cst_65 {dimension_numbers = #tpu.dot_dimension_numbers<[1], [0], [0], [1], [0, 0, 1, 1], [], []>} : vector<8x32xf32>, vector<32x8xf32>, vector<8x8xf32> -> vector<8x8xf32>
    %c6_66 = arith.constant 6 : index
    %c0_67 = arith.constant 0 : index
    %c0_68 = arith.constant 0 : index
    %65 = vector.load %arg5[%c6_66, %c0_67, %c0_68] : memref<12x1x8xf32, #tpu.memory_space<vmem>>, vector<1x1x8xf32>
    %66 = vector.shape_cast %65 : vector<1x1x8xf32> to vector<1x8xf32>
    %67 = vector.broadcast %66 : vector<1x8xf32> to vector<8x8xf32>
    %68 = arith.addf %64, %67 : vector<8x8xf32>
    %c16_69 = arith.constant 16 : index
    %c0_70 = arith.constant 0 : index
    %69 = vector.load %arg10[%c16_69, %c0_70] : memref<32x8xf32, #tpu.memory_space<vmem>>, vector<8x8xf32>
    tpu.vector_store %arg10[%c16_69, %c0_70], %68 {strides = array<i32>} : memref<32x8xf32, #tpu.memory_space<vmem>>, vector<8x8xf32>,
    %c10 = arith.constant 10 : index
    %c0_71 = arith.constant 0 : index
    %c0_72 = arith.constant 0 : index
    %70 = vector.load %arg4[%c10, %c0_71, %c0_72] : memref<12x32x8xf32, #tpu.memory_space<vmem>>, vector<1x32x8xf32>
    %71 = vector.shape_cast %70 : vector<1x32x8xf32> to vector<32x8xf32>
    %cst_73 = arith.constant dense<0.000000e+00> : vector<8x8xf32>
    %72 = tpu.matmul %5, %71, %cst_73 {dimension_numbers = #tpu.dot_dimension_numbers<[1], [0], [0], [1], [0, 0, 1, 1], [], []>} : vector<8x32xf32>, vector<32x8xf32>, vector<8x8xf32> -> vector<8x8xf32>
    %c10_74 = arith.constant 10 : index
    %c0_75 = arith.constant 0 : index
    %c0_76 = arith.constant 0 : index
    %73 = vector.load %arg5[%c10_74, %c0_75, %c0_76] : memref<12x1x8xf32, #tpu.memory_space<vmem>>, vector<1x1x8xf32>
    %74 = vector.shape_cast %73 : vector<1x1x8xf32> to vector<1x8xf32>
    %75 = vector.broadcast %74 : vector<1x8xf32> to vector<8x8xf32>
    %76 = arith.addf %72, %75 : vector<8x8xf32>
    %c16_77 = arith.constant 16 : index
    %c0_78 = arith.constant 0 : index
    %77 = vector.load %arg11[%c16_77, %c0_78] : memref<32x8xf32, #tpu.memory_space<vmem>>, vector<8x8xf32>
    tpu.vector_store %arg11[%c16_77, %c0_78], %76 {strides = array<i32>} : memref<32x8xf32, #tpu.memory_space<vmem>>, vector<8x8xf32>,
    %c3 = arith.constant 3 : index
    %c0_79 = arith.constant 0 : index
    %c0_80 = arith.constant 0 : index
    %78 = vector.load %arg4[%c3, %c0_79, %c0_80] : memref<12x32x8xf32, #tpu.memory_space<vmem>>, vector<1x32x8xf32>
    %79 = vector.shape_cast %78 : vector<1x32x8xf32> to vector<32x8xf32>
    %cst_81 = arith.constant dense<0.000000e+00> : vector<8x8xf32>
    %80 = tpu.matmul %1, %79, %cst_81 {dimension_numbers = #tpu.dot_dimension_numbers<[1], [0], [0], [1], [0, 0, 1, 1], [], []>} : vector<8x32xf32>, vector<32x8xf32>, vector<8x8xf32> -> vector<8x8xf32>
    %c3_82 = arith.constant 3 : index
    %c0_83 = arith.constant 0 : index
    %c0_84 = arith.constant 0 : index
    %81 = vector.load %arg5[%c3_82, %c0_83, %c0_84] : memref<12x1x8xf32, #tpu.memory_space<vmem>>, vector<1x1x8xf32>
    %82 = vector.shape_cast %81 : vector<1x1x8xf32> to vector<1x8xf32>
    %83 = vector.broadcast %82 : vector<1x8xf32> to vector<8x8xf32>
    %84 = arith.addf %80, %83 : vector<8x8xf32>
    %c24 = arith.constant 24 : index
    %c0_85 = arith.constant 0 : index
    %85 = vector.load %arg9[%c24, %c0_85] : memref<32x8xf32, #tpu.memory_space<vmem>>, vector<8x8xf32>
    tpu.vector_store %arg9[%c24, %c0_85], %84 {strides = array<i32>} : memref<32x8xf32, #tpu.memory_space<vmem>>, vector<8x8xf32>,
    %c7 = arith.constant 7 : index
    %c0_86 = arith.constant 0 : index
    %c0_87 = arith.constant 0 : index
    %86 = vector.load %arg4[%c7, %c0_86, %c0_87] : memref<12x32x8xf32, #tpu.memory_space<vmem>>, vector<1x32x8xf32>
    %87 = vector.shape_cast %86 : vector<1x32x8xf32> to vector<32x8xf32>
    %cst_88 = arith.constant dense<0.000000e+00> : vector<8x8xf32>
    %88 = tpu.matmul %3, %87, %cst_88 {dimension_numbers = #tpu.dot_dimension_numbers<[1], [0], [0], [1], [0, 0, 1, 1], [], []>} : vector<8x32xf32>, vector<32x8xf32>, vector<8x8xf32> -> vector<8x8xf32>
    %c7_89 = arith.constant 7 : index
    %c0_90 = arith.constant 0 : index
    %c0_91 = arith.constant 0 : index
    %89 = vector.load %arg5[%c7_89, %c0_90, %c0_91] : memref<12x1x8xf32, #tpu.memory_space<vmem>>, vector<1x1x8xf32>
    %90 = vector.shape_cast %89 : vector<1x1x8xf32> to vector<1x8xf32>
    %91 = vector.broadcast %90 : vector<1x8xf32> to vector<8x8xf32>
    %92 = arith.addf %88, %91 : vector<8x8xf32>
    %c24_92 = arith.constant 24 : index
    %c0_93 = arith.constant 0 : index
    %93 = vector.load %arg10[%c24_92, %c0_93] : memref<32x8xf32, #tpu.memory_space<vmem>>, vector<8x8xf32>
    tpu.vector_store %arg10[%c24_92, %c0_93], %92 {strides = array<i32>} : memref<32x8xf32, #tpu.memory_space<vmem>>, vector<8x8xf32>,
    %c11 = arith.constant 11 : index
    %c0_94 = arith.constant 0 : index
    %c0_95 = arith.constant 0 : index
    %94 = vector.load %arg4[%c11, %c0_94, %c0_95] : memref<12x32x8xf32, #tpu.memory_space<vmem>>, vector<1x32x8xf32>
    %95 = vector.shape_cast %94 : vector<1x32x8xf32> to vector<32x8xf32>
    %cst_96 = arith.constant dense<0.000000e+00> : vector<8x8xf32>
    %96 = tpu.matmul %5, %95, %cst_96 {dimension_numbers = #tpu.dot_dimension_numbers<[1], [0], [0], [1], [0, 0, 1, 1], [], []>} : vector<8x32xf32>, vector<32x8xf32>, vector<8x8xf32> -> vector<8x8xf32>
    %c11_97 = arith.constant 11 : index
    %c0_98 = arith.constant 0 : index
    %c0_99 = arith.constant 0 : index
    %97 = vector.load %arg5[%c11_97, %c0_98, %c0_99] : memref<12x1x8xf32, #tpu.memory_space<vmem>>, vector<1x1x8xf32>
    %98 = vector.shape_cast %97 : vector<1x1x8xf32> to vector<1x8xf32>
    %99 = vector.broadcast %98 : vector<1x8xf32> to vector<8x8xf32>
    %100 = arith.addf %96, %99 : vector<8x8xf32>
    %c24_100 = arith.constant 24 : index
    %c0_101 = arith.constant 0 : index
    %101 = vector.load %arg11[%c24_100, %c0_101] : memref<32x8xf32, #tpu.memory_space<vmem>>, vector<8x8xf32>
    tpu.vector_store %arg11[%c24_100, %c0_101], %100 {strides = array<i32>} : memref<32x8xf32, #tpu.memory_space<vmem>>, vector<8x8xf32>,
    %c0_102 = arith.constant 0 : index
    %c0_103 = arith.constant 0 : index
    %102 = vector.load %arg9[%c0_102, %c0_103] : memref<32x8xf32, #tpu.memory_space<vmem>>, vector<32x8xf32>
    %c0_104 = arith.constant 0 : index
    %c0_105 = arith.constant 0 : index
    %103 = vector.load %arg10[%c0_104, %c0_105] : memref<32x8xf32, #tpu.memory_space<vmem>>, vector<32x8xf32>
    %c0_106 = arith.constant 0 : index
    %c0_107 = arith.constant 0 : index
    %104 = vector.load %arg11[%c0_106, %c0_107] : memref<32x8xf32, #tpu.memory_space<vmem>>, vector<32x8xf32>
    "tpu.trace_start"() <{level = 10 : i32, message = "pd,qd->pq"}> : () -> ()
    %cst_108 = arith.constant dense<0.000000e+00> : vector<32x32xf32>
    %105 = tpu.matmul %102, %103, %cst_108 {dimension_numbers = #tpu.dot_dimension_numbers<[1], [1], [0], [0], [0, 0, 1, 0], [], []>} : vector<32x8xf32>, vector<32x8xf32>, vector<32x32xf32> -> vector<32x32xf32>
    "tpu.trace_stop"() : () -> ()
    %c0_109 = arith.constant 0 : index
    %c0_110 = arith.constant 0 : index
    %106 = vector.load %arg7[%c0_109, %c0_110] : memref<32x32xf32, #tpu.memory_space<vmem>>, vector<32x32xf32>
    %107 = arith.addf %105, %106 : vector<32x32xf32>
    %cst_111 = arith.constant dense<0xFF800000> : vector<32xf32>
    %108 = vector.multi_reduction <maximumf>, %107, %cst_111 [1] : vector<32x32xf32> to vector<32xf32>
    %109 = vector.shape_cast %108 : vector<32xf32> to vector<32x1xf32>
    %110 = vector.broadcast %109 : vector<32x1xf32> to vector<32x32xf32>
    %111 = arith.subf %107, %110 : vector<32x32xf32>
    %112 = math.exp %111 : vector<32x32xf32>
    %cst_112 = arith.constant dense<0.000000e+00> : vector<32xf32>
    %113 = vector.multi_reduction <add>, %112, %cst_112 [1] : vector<32x32xf32> to vector<32xf32>
    %114 = vector.shape_cast %113 : vector<32xf32> to vector<32x1xf32>
    %115 = tpu.reciprocal %114 {approx = true} : vector<32x1xf32> -> vector<32x1xf32>
    %116 = arith.mulf %114, %115 : vector<32x1xf32>
    %cst_113 = arith.constant 2.000000e+00 : f32
    %117 = vector.broadcast %cst_113 : f32 to vector<32x1xf32>
    %118 = arith.subf %117, %116 : vector<32x1xf32>
    %119 = arith.mulf %115, %118 : vector<32x1xf32>
    %120 = vector.broadcast %119 : vector<32x1xf32> to vector<32x32xf32>
    %121 = arith.mulf %112, %120 : vector<32x32xf32>
    %cst_114 = arith.constant dense<0.000000e+00> : vector<32x8xf32>
    %122 = tpu.matmul %121, %104, %cst_114 {dimension_numbers = #tpu.dot_dimension_numbers<[1], [0], [0], [1], [0, 0, 1, 1], [], []>} : vector<32x32xf32>, vector<32x8xf32>, vector<32x8xf32> -> vector<32x8xf32>
    %123 = vector.extract_strided_slice %122 {offsets = [0, 0], sizes = [8, 8], strides = [1, 1]} : vector<32x8xf32> to vector<8x8xf32>
    %c0_115 = arith.constant 0 : index
    %c0_116 = arith.constant 0 : index
    %c0_117 = arith.constant 0 : index
    %124 = vector.load %arg6[%c0_115, %c0_116, %c0_117] : memref<4x8x32xf32, #tpu.memory_space<vmem>>, vector<1x8x32xf32>
    %125 = vector.shape_cast %124 : vector<1x8x32xf32> to vector<8x32xf32>
    %cst_118 = arith.constant dense<0.000000e+00> : vector<8x32xf32>
    %126 = tpu.matmul %123, %125, %cst_118 {dimension_numbers = #tpu.dot_dimension_numbers<[1], [0], [0], [1], [0, 0, 1, 1], [], []>} : vector<8x8xf32>, vector<8x32xf32>, vector<8x32xf32> -> vector<8x32xf32>
    %127 = vector.extract_strided_slice %122 {offsets = [8, 0], sizes = [8, 8], strides = [1, 1]} : vector<32x8xf32> to vector<8x8xf32>
    %c1_119 = arith.constant 1 : index
    %c0_120 = arith.constant 0 : index
    %c0_121 = arith.constant 0 : index
    %128 = vector.load %arg6[%c1_119, %c0_120, %c0_121] : memref<4x8x32xf32, #tpu.memory_space<vmem>>, vector<1x8x32xf32>
    %129 = vector.shape_cast %128 : vector<1x8x32xf32> to vector<8x32xf32>
    %cst_122 = arith.constant dense<0.000000e+00> : vector<8x32xf32>
    %130 = tpu.matmul %127, %129, %cst_122 {dimension_numbers = #tpu.dot_dimension_numbers<[1], [0], [0], [1], [0, 0, 1, 1], [], []>} : vector<8x8xf32>, vector<8x32xf32>, vector<8x32xf32> -> vector<8x32xf32>
    %131 = arith.addf %126, %130 : vector<8x32xf32>
    %132 = vector.extract_strided_slice %122 {offsets = [16, 0], sizes = [8, 8], strides = [1, 1]} : vector<32x8xf32> to vector<8x8xf32>
    %c2_123 = arith.constant 2 : index
    %c0_124 = arith.constant 0 : index
    %c0_125 = arith.constant 0 : index
    %133 = vector.load %arg6[%c2_123, %c0_124, %c0_125] : memref<4x8x32xf32, #tpu.memory_space<vmem>>, vector<1x8x32xf32>
    %134 = vector.shape_cast %133 : vector<1x8x32xf32> to vector<8x32xf32>
    %cst_126 = arith.constant dense<0.000000e+00> : vector<8x32xf32>
    %135 = tpu.matmul %132, %134, %cst_126 {dimension_numbers = #tpu.dot_dimension_numbers<[1], [0], [0], [1], [0, 0, 1, 1], [], []>} : vector<8x8xf32>, vector<8x32xf32>, vector<8x32xf32> -> vector<8x32xf32>
    %136 = arith.addf %131, %135 : vector<8x32xf32>
    %137 = vector.extract_strided_slice %122 {offsets = [24, 0], sizes = [8, 8], strides = [1, 1]} : vector<32x8xf32> to vector<8x8xf32>
    %c3_127 = arith.constant 3 : index
    %c0_128 = arith.constant 0 : index
    %c0_129 = arith.constant 0 : index
    %138 = vector.load %arg6[%c3_127, %c0_128, %c0_129] : memref<4x8x32xf32, #tpu.memory_space<vmem>>, vector<1x8x32xf32>
    %139 = vector.shape_cast %138 : vector<1x8x32xf32> to vector<8x32xf32>
    %cst_130 = arith.constant dense<0.000000e+00> : vector<8x32xf32>
    %140 = tpu.matmul %137, %139, %cst_130 {dimension_numbers = #tpu.dot_dimension_numbers<[1], [0], [0], [1], [0, 0, 1, 1], [], []>} : vector<8x8xf32>, vector<8x32xf32>, vector<8x32xf32> -> vector<8x32xf32>
    %141 = arith.addf %136, %140 : vector<8x32xf32>
    %c0_131 = arith.constant 0 : index
    %c0_132 = arith.constant 0 : index
    %c0_133 = arith.constant 0 : index
    %142 = vector.load %arg8[%c0_131, %c0_132, %c0_133] : memref<2x8x32xf32, #tpu.memory_space<vmem>>, vector<1x8x32xf32>
    %143 = vector.shape_cast %142 : vector<1x8x32xf32> to vector<8x32xf32>
    %144 = vector.shape_cast %141 : vector<8x32xf32> to vector<1x8x32xf32>
    tpu.vector_store %arg8[%c0_131, %c0_132, %c0_133], %144 {strides = array<i32>} : memref<2x8x32xf32, #tpu.memory_space<vmem>>, vector<1x8x32xf32>,
    %c1_134 = arith.constant 1 : index
    %c0_135 = arith.constant 0 : index
    %c0_136 = arith.constant 0 : index
    %145 = vector.load %arg1[%c1_134, %c0_135, %c0_136] : memref<2x8x32xf32, #tpu.memory_space<vmem>>, vector<1x8x32xf32>
    %146 = vector.shape_cast %145 : vector<1x8x32xf32> to vector<8x32xf32>
    %c1_137 = arith.constant 1 : index
    %c0_138 = arith.constant 0 : index
    %c0_139 = arith.constant 0 : index
    %147 = vector.load %arg2[%c1_137, %c0_138, %c0_139] : memref<2x8x32xf32, #tpu.memory_space<vmem>>, vector<1x8x32xf32>
    %148 = vector.shape_cast %147 : vector<1x8x32xf32> to vector<8x32xf32>
    %c1_140 = arith.constant 1 : index
    %c0_141 = arith.constant 0 : index
    %c0_142 = arith.constant 0 : index
    %149 = vector.load %arg3[%c1_140, %c0_141, %c0_142] : memref<2x8x32xf32, #tpu.memory_space<vmem>>, vector<1x8x32xf32>
    %150 = vector.shape_cast %149 : vector<1x8x32xf32> to vector<8x32xf32>
    %c0_143 = arith.constant 0 : index
    %c0_144 = arith.constant 0 : index
    %c0_145 = arith.constant 0 : index
    %151 = vector.load %arg4[%c0_143, %c0_144, %c0_145] : memref<12x32x8xf32, #tpu.memory_space<vmem>>, vector<1x32x8xf32>
    %152 = vector.shape_cast %151 : vector<1x32x8xf32> to vector<32x8xf32>
    %cst_146 = arith.constant dense<0.000000e+00> : vector<8x8xf32>
    %153 = tpu.matmul %146, %152, %cst_146 {dimension_numbers = #tpu.dot_dimension_numbers<[1], [0], [0], [1], [0, 0, 1, 1], [], []>} : vector<8x32xf32>, vector<32x8xf32>, vector<8x8xf32> -> vector<8x8xf32>
    %c0_147 = arith.constant 0 : index
    %c0_148 = arith.constant 0 : index
    %c0_149 = arith.constant 0 : index
    %154 = vector.load %arg5[%c0_147, %c0_148, %c0_149] : memref<12x1x8xf32, #tpu.memory_space<vmem>>, vector<1x1x8xf32>
    %155 = vector.shape_cast %154 : vector<1x1x8xf32> to vector<1x8xf32>
    %156 = vector.broadcast %155 : vector<1x8xf32> to vector<8x8xf32>
    %157 = arith.addf %153, %156 : vector<8x8xf32>
    %c0_150 = arith.constant 0 : index
    %c0_151 = arith.constant 0 : index
    %158 = vector.load %arg9[%c0_150, %c0_151] : memref<32x8xf32, #tpu.memory_space<vmem>>, vector<8x8xf32>
    tpu.vector_store %arg9[%c0_150, %c0_151], %157 {strides = array<i32>} : memref<32x8xf32, #tpu.memory_space<vmem>>, vector<8x8xf32>,
    %c4_152 = arith.constant 4 : index
    %c0_153 = arith.constant 0 : index
    %c0_154 = arith.constant 0 : index
    %159 = vector.load %arg4[%c4_152, %c0_153, %c0_154] : memref<12x32x8xf32, #tpu.memory_space<vmem>>, vector<1x32x8xf32>
    %160 = vector.shape_cast %159 : vector<1x32x8xf32> to vector<32x8xf32>
    %cst_155 = arith.constant dense<0.000000e+00> : vector<8x8xf32>
    %161 = tpu.matmul %148, %160, %cst_155 {dimension_numbers = #tpu.dot_dimension_numbers<[1], [0], [0], [1], [0, 0, 1, 1], [], []>} : vector<8x32xf32>, vector<32x8xf32>, vector<8x8xf32> -> vector<8x8xf32>
    %c4_156 = arith.constant 4 : index
    %c0_157 = arith.constant 0 : index
    %c0_158 = arith.constant 0 : index
    %162 = vector.load %arg5[%c4_156, %c0_157, %c0_158] : memref<12x1x8xf32, #tpu.memory_space<vmem>>, vector<1x1x8xf32>
    %163 = vector.shape_cast %162 : vector<1x1x8xf32> to vector<1x8xf32>
    %164 = vector.broadcast %163 : vector<1x8xf32> to vector<8x8xf32>
    %165 = arith.addf %161, %164 : vector<8x8xf32>
    %c0_159 = arith.constant 0 : index
    %c0_160 = arith.constant 0 : index
    %166 = vector.load %arg10[%c0_159, %c0_160] : memref<32x8xf32, #tpu.memory_space<vmem>>, vector<8x8xf32>
    tpu.vector_store %arg10[%c0_159, %c0_160], %165 {strides = array<i32>} : memref<32x8xf32, #tpu.memory_space<vmem>>, vector<8x8xf32>,
    %c8_161 = arith.constant 8 : index
    %c0_162 = arith.constant 0 : index
    %c0_163 = arith.constant 0 : index
    %167 = vector.load %arg4[%c8_161, %c0_162, %c0_163] : memref<12x32x8xf32, #tpu.memory_space<vmem>>, vector<1x32x8xf32>
    %168 = vector.shape_cast %167 : vector<1x32x8xf32> to vector<32x8xf32>
    %cst_164 = arith.constant dense<0.000000e+00> : vector<8x8xf32>
    %169 = tpu.matmul %150, %168, %cst_164 {dimension_numbers = #tpu.dot_dimension_numbers<[1], [0], [0], [1], [0, 0, 1, 1], [], []>} : vector<8x32xf32>, vector<32x8xf32>, vector<8x8xf32> -> vector<8x8xf32>
    %c8_165 = arith.constant 8 : index
    %c0_166 = arith.constant 0 : index
    %c0_167 = arith.constant 0 : index
    %170 = vector.load %arg5[%c8_165, %c0_166, %c0_167] : memref<12x1x8xf32, #tpu.memory_space<vmem>>, vector<1x1x8xf32>
    %171 = vector.shape_cast %170 : vector<1x1x8xf32> to vector<1x8xf32>
    %172 = vector.broadcast %171 : vector<1x8xf32> to vector<8x8xf32>
    %173 = arith.addf %169, %172 : vector<8x8xf32>
    %c0_168 = arith.constant 0 : index
    %c0_169 = arith.constant 0 : index
    %174 = vector.load %arg11[%c0_168, %c0_169] : memref<32x8xf32, #tpu.memory_space<vmem>>, vector<8x8xf32>
    tpu.vector_store %arg11[%c0_168, %c0_169], %173 {strides = array<i32>} : memref<32x8xf32, #tpu.memory_space<vmem>>, vector<8x8xf32>,
    %c1_170 = arith.constant 1 : index
    %c0_171 = arith.constant 0 : index
    %c0_172 = arith.constant 0 : index
    %175 = vector.load %arg4[%c1_170, %c0_171, %c0_172] : memref<12x32x8xf32, #tpu.memory_space<vmem>>, vector<1x32x8xf32>
    %176 = vector.shape_cast %175 : vector<1x32x8xf32> to vector<32x8xf32>
    %cst_173 = arith.constant dense<0.000000e+00> : vector<8x8xf32>
    %177 = tpu.matmul %146, %176, %cst_173 {dimension_numbers = #tpu.dot_dimension_numbers<[1], [0], [0], [1], [0, 0, 1, 1], [], []>} : vector<8x32xf32>, vector<32x8xf32>, vector<8x8xf32> -> vector<8x8xf32>
    %c1_174 = arith.constant 1 : index
    %c0_175 = arith.constant 0 : index
    %c0_176 = arith.constant 0 : index
    %178 = vector.load %arg5[%c1_174, %c0_175, %c0_176] : memref<12x1x8xf32, #tpu.memory_space<vmem>>, vector<1x1x8xf32>
    %179 = vector.shape_cast %178 : vector<1x1x8xf32> to vector<1x8xf32>
    %180 = vector.broadcast %179 : vector<1x8xf32> to vector<8x8xf32>
    %181 = arith.addf %177, %180 : vector<8x8xf32>
    %c8_177 = arith.constant 8 : index
    %c0_178 = arith.constant 0 : index
    %182 = vector.load %arg9[%c8_177, %c0_178] : memref<32x8xf32, #tpu.memory_space<vmem>>, vector<8x8xf32>
    tpu.vector_store %arg9[%c8_177, %c0_178], %181 {strides = array<i32>} : memref<32x8xf32, #tpu.memory_space<vmem>>, vector<8x8xf32>,
    %c5_179 = arith.constant 5 : index
    %c0_180 = arith.constant 0 : index
    %c0_181 = arith.constant 0 : index
    %183 = vector.load %arg4[%c5_179, %c0_180, %c0_181] : memref<12x32x8xf32, #tpu.memory_space<vmem>>, vector<1x32x8xf32>
    %184 = vector.shape_cast %183 : vector<1x32x8xf32> to vector<32x8xf32>
    %cst_182 = arith.constant dense<0.000000e+00> : vector<8x8xf32>
    %185 = tpu.matmul %148, %184, %cst_182 {dimension_numbers = #tpu.dot_dimension_numbers<[1], [0], [0], [1], [0, 0, 1, 1], [], []>} : vector<8x32xf32>, vector<32x8xf32>, vector<8x8xf32> -> vector<8x8xf32>
    %c5_183 = arith.constant 5 : index
    %c0_184 = arith.constant 0 : index
    %c0_185 = arith.constant 0 : index
    %186 = vector.load %arg5[%c5_183, %c0_184, %c0_185] : memref<12x1x8xf32, #tpu.memory_space<vmem>>, vector<1x1x8xf32>
    %187 = vector.shape_cast %186 : vector<1x1x8xf32> to vector<1x8xf32>
    %188 = vector.broadcast %187 : vector<1x8xf32> to vector<8x8xf32>
    %189 = arith.addf %185, %188 : vector<8x8xf32>
    %c8_186 = arith.constant 8 : index
    %c0_187 = arith.constant 0 : index
    %190 = vector.load %arg10[%c8_186, %c0_187] : memref<32x8xf32, #tpu.memory_space<vmem>>, vector<8x8xf32>
    tpu.vector_store %arg10[%c8_186, %c0_187], %189 {strides = array<i32>} : memref<32x8xf32, #tpu.memory_space<vmem>>, vector<8x8xf32>,
    %c9_188 = arith.constant 9 : index
    %c0_189 = arith.constant 0 : index
    %c0_190 = arith.constant 0 : index
    %191 = vector.load %arg4[%c9_188, %c0_189, %c0_190] : memref<12x32x8xf32, #tpu.memory_space<vmem>>, vector<1x32x8xf32>
    %192 = vector.shape_cast %191 : vector<1x32x8xf32> to vector<32x8xf32>
    %cst_191 = arith.constant dense<0.000000e+00> : vector<8x8xf32>
    %193 = tpu.matmul %150, %192, %cst_191 {dimension_numbers = #tpu.dot_dimension_numbers<[1], [0], [0], [1], [0, 0, 1, 1], [], []>} : vector<8x32xf32>, vector<32x8xf32>, vector<8x8xf32> -> vector<8x8xf32>
    %c9_192 = arith.constant 9 : index
    %c0_193 = arith.constant 0 : index
    %c0_194 = arith.constant 0 : index
    %194 = vector.load %arg5[%c9_192, %c0_193, %c0_194] : memref<12x1x8xf32, #tpu.memory_space<vmem>>, vector<1x1x8xf32>
    %195 = vector.shape_cast %194 : vector<1x1x8xf32> to vector<1x8xf32>
    %196 = vector.broadcast %195 : vector<1x8xf32> to vector<8x8xf32>
    %197 = arith.addf %193, %196 : vector<8x8xf32>
    %c8_195 = arith.constant 8 : index
    %c0_196 = arith.constant 0 : index
    %198 = vector.load %arg11[%c8_195, %c0_196] : memref<32x8xf32, #tpu.memory_space<vmem>>, vector<8x8xf32>
    tpu.vector_store %arg11[%c8_195, %c0_196], %197 {strides = array<i32>} : memref<32x8xf32, #tpu.memory_space<vmem>>, vector<8x8xf32>,
    %c2_197 = arith.constant 2 : index
    %c0_198 = arith.constant 0 : index
    %c0_199 = arith.constant 0 : index
    %199 = vector.load %arg4[%c2_197, %c0_198, %c0_199] : memref<12x32x8xf32, #tpu.memory_space<vmem>>, vector<1x32x8xf32>
    %200 = vector.shape_cast %199 : vector<1x32x8xf32> to vector<32x8xf32>
    %cst_200 = arith.constant dense<0.000000e+00> : vector<8x8xf32>
    %201 = tpu.matmul %146, %200, %cst_200 {dimension_numbers = #tpu.dot_dimension_numbers<[1], [0], [0], [1], [0, 0, 1, 1], [], []>} : vector<8x32xf32>, vector<32x8xf32>, vector<8x8xf32> -> vector<8x8xf32>
    %c2_201 = arith.constant 2 : index
    %c0_202 = arith.constant 0 : index
    %c0_203 = arith.constant 0 : index
    %202 = vector.load %arg5[%c2_201, %c0_202, %c0_203] : memref<12x1x8xf32, #tpu.memory_space<vmem>>, vector<1x1x8xf32>
    %203 = vector.shape_cast %202 : vector<1x1x8xf32> to vector<1x8xf32>
    %204 = vector.broadcast %203 : vector<1x8xf32> to vector<8x8xf32>
    %205 = arith.addf %201, %204 : vector<8x8xf32>
    %c16_204 = arith.constant 16 : index
    %c0_205 = arith.constant 0 : index
    %206 = vector.load %arg9[%c16_204, %c0_205] : memref<32x8xf32, #tpu.memory_space<vmem>>, vector<8x8xf32>
    tpu.vector_store %arg9[%c16_204, %c0_205], %205 {strides = array<i32>} : memref<32x8xf32, #tpu.memory_space<vmem>>, vector<8x8xf32>,
    %c6_206 = arith.constant 6 : index
    %c0_207 = arith.constant 0 : index
    %c0_208 = arith.constant 0 : index
    %207 = vector.load %arg4[%c6_206, %c0_207, %c0_208] : memref<12x32x8xf32, #tpu.memory_space<vmem>>, vector<1x32x8xf32>
    %208 = vector.shape_cast %207 : vector<1x32x8xf32> to vector<32x8xf32>
    %cst_209 = arith.constant dense<0.000000e+00> : vector<8x8xf32>
    %209 = tpu.matmul %148, %208, %cst_209 {dimension_numbers = #tpu.dot_dimension_numbers<[1], [0], [0], [1], [0, 0, 1, 1], [], []>} : vector<8x32xf32>, vector<32x8xf32>, vector<8x8xf32> -> vector<8x8xf32>
    %c6_210 = arith.constant 6 : index
    %c0_211 = arith.constant 0 : index
    %c0_212 = arith.constant 0 : index
    %210 = vector.load %arg5[%c6_210, %c0_211, %c0_212] : memref<12x1x8xf32, #tpu.memory_space<vmem>>, vector<1x1x8xf32>
    %211 = vector.shape_cast %210 : vector<1x1x8xf32> to vector<1x8xf32>
    %212 = vector.broadcast %211 : vector<1x8xf32> to vector<8x8xf32>
    %213 = arith.addf %209, %212 : vector<8x8xf32>
    %c16_213 = arith.constant 16 : index
    %c0_214 = arith.constant 0 : index
    %214 = vector.load %arg10[%c16_213, %c0_214] : memref<32x8xf32, #tpu.memory_space<vmem>>, vector<8x8xf32>
    tpu.vector_store %arg10[%c16_213, %c0_214], %213 {strides = array<i32>} : memref<32x8xf32, #tpu.memory_space<vmem>>, vector<8x8xf32>,
    %c10_215 = arith.constant 10 : index
    %c0_216 = arith.constant 0 : index
    %c0_217 = arith.constant 0 : index
    %215 = vector.load %arg4[%c10_215, %c0_216, %c0_217] : memref<12x32x8xf32, #tpu.memory_space<vmem>>, vector<1x32x8xf32>
    %216 = vector.shape_cast %215 : vector<1x32x8xf32> to vector<32x8xf32>
    %cst_218 = arith.constant dense<0.000000e+00> : vector<8x8xf32>
    %217 = tpu.matmul %150, %216, %cst_218 {dimension_numbers = #tpu.dot_dimension_numbers<[1], [0], [0], [1], [0, 0, 1, 1], [], []>} : vector<8x32xf32>, vector<32x8xf32>, vector<8x8xf32> -> vector<8x8xf32>
    %c10_219 = arith.constant 10 : index
    %c0_220 = arith.constant 0 : index
    %c0_221 = arith.constant 0 : index
    %218 = vector.load %arg5[%c10_219, %c0_220, %c0_221] : memref<12x1x8xf32, #tpu.memory_space<vmem>>, vector<1x1x8xf32>
    %219 = vector.shape_cast %218 : vector<1x1x8xf32> to vector<1x8xf32>
    %220 = vector.broadcast %219 : vector<1x8xf32> to vector<8x8xf32>
    %221 = arith.addf %217, %220 : vector<8x8xf32>
    %c16_222 = arith.constant 16 : index
    %c0_223 = arith.constant 0 : index
    %222 = vector.load %arg11[%c16_222, %c0_223] : memref<32x8xf32, #tpu.memory_space<vmem>>, vector<8x8xf32>
    tpu.vector_store %arg11[%c16_222, %c0_223], %221 {strides = array<i32>} : memref<32x8xf32, #tpu.memory_space<vmem>>, vector<8x8xf32>,
    %c3_224 = arith.constant 3 : index
    %c0_225 = arith.constant 0 : index
    %c0_226 = arith.constant 0 : index
    %223 = vector.load %arg4[%c3_224, %c0_225, %c0_226] : memref<12x32x8xf32, #tpu.memory_space<vmem>>, vector<1x32x8xf32>
    %224 = vector.shape_cast %223 : vector<1x32x8xf32> to vector<32x8xf32>
    %cst_227 = arith.constant dense<0.000000e+00> : vector<8x8xf32>
    %225 = tpu.matmul %146, %224, %cst_227 {dimension_numbers = #tpu.dot_dimension_numbers<[1], [0], [0], [1], [0, 0, 1, 1], [], []>} : vector<8x32xf32>, vector<32x8xf32>, vector<8x8xf32> -> vector<8x8xf32>
    %c3_228 = arith.constant 3 : index
    %c0_229 = arith.constant 0 : index
    %c0_230 = arith.constant 0 : index
    %226 = vector.load %arg5[%c3_228, %c0_229, %c0_230] : memref<12x1x8xf32, #tpu.memory_space<vmem>>, vector<1x1x8xf32>
    %227 = vector.shape_cast %226 : vector<1x1x8xf32> to vector<1x8xf32>
    %228 = vector.broadcast %227 : vector<1x8xf32> to vector<8x8xf32>
    %229 = arith.addf %225, %228 : vector<8x8xf32>
    %c24_231 = arith.constant 24 : index
    %c0_232 = arith.constant 0 : index
    %230 = vector.load %arg9[%c24_231, %c0_232] : memref<32x8xf32, #tpu.memory_space<vmem>>, vector<8x8xf32>
    tpu.vector_store %arg9[%c24_231, %c0_232], %229 {strides = array<i32>} : memref<32x8xf32, #tpu.memory_space<vmem>>, vector<8x8xf32>,
    %c7_233 = arith.constant 7 : index
    %c0_234 = arith.constant 0 : index
    %c0_235 = arith.constant 0 : index
    %231 = vector.load %arg4[%c7_233, %c0_234, %c0_235] : memref<12x32x8xf32, #tpu.memory_space<vmem>>, vector<1x32x8xf32>
    %232 = vector.shape_cast %231 : vector<1x32x8xf32> to vector<32x8xf32>
    %cst_236 = arith.constant dense<0.000000e+00> : vector<8x8xf32>
    %233 = tpu.matmul %148, %232, %cst_236 {dimension_numbers = #tpu.dot_dimension_numbers<[1], [0], [0], [1], [0, 0, 1, 1], [], []>} : vector<8x32xf32>, vector<32x8xf32>, vector<8x8xf32> -> vector<8x8xf32>
    %c7_237 = arith.constant 7 : index
    %c0_238 = arith.constant 0 : index
    %c0_239 = arith.constant 0 : index
    %234 = vector.load %arg5[%c7_237, %c0_238, %c0_239] : memref<12x1x8xf32, #tpu.memory_space<vmem>>, vector<1x1x8xf32>
    %235 = vector.shape_cast %234 : vector<1x1x8xf32> to vector<1x8xf32>
    %236 = vector.broadcast %235 : vector<1x8xf32> to vector<8x8xf32>
    %237 = arith.addf %233, %236 : vector<8x8xf32>
    %c24_240 = arith.constant 24 : index
    %c0_241 = arith.constant 0 : index
    %238 = vector.load %arg10[%c24_240, %c0_241] : memref<32x8xf32, #tpu.memory_space<vmem>>, vector<8x8xf32>
    tpu.vector_store %arg10[%c24_240, %c0_241], %237 {strides = array<i32>} : memref<32x8xf32, #tpu.memory_space<vmem>>, vector<8x8xf32>,
    %c11_242 = arith.constant 11 : index
    %c0_243 = arith.constant 0 : index
    %c0_244 = arith.constant 0 : index
    %239 = vector.load %arg4[%c11_242, %c0_243, %c0_244] : memref<12x32x8xf32, #tpu.memory_space<vmem>>, vector<1x32x8xf32>
    %240 = vector.shape_cast %239 : vector<1x32x8xf32> to vector<32x8xf32>
    %cst_245 = arith.constant dense<0.000000e+00> : vector<8x8xf32>
    %241 = tpu.matmul %150, %240, %cst_245 {dimension_numbers = #tpu.dot_dimension_numbers<[1], [0], [0], [1], [0, 0, 1, 1], [], []>} : vector<8x32xf32>, vector<32x8xf32>, vector<8x8xf32> -> vector<8x8xf32>
    %c11_246 = arith.constant 11 : index
    %c0_247 = arith.constant 0 : index
    %c0_248 = arith.constant 0 : index
    %242 = vector.load %arg5[%c11_246, %c0_247, %c0_248] : memref<12x1x8xf32, #tpu.memory_space<vmem>>, vector<1x1x8xf32>
    %243 = vector.shape_cast %242 : vector<1x1x8xf32> to vector<1x8xf32>
    %244 = vector.broadcast %243 : vector<1x8xf32> to vector<8x8xf32>
    %245 = arith.addf %241, %244 : vector<8x8xf32>
    %c24_249 = arith.constant 24 : index
    %c0_250 = arith.constant 0 : index
    %246 = vector.load %arg11[%c24_249, %c0_250] : memref<32x8xf32, #tpu.memory_space<vmem>>, vector<8x8xf32>
    tpu.vector_store %arg11[%c24_249, %c0_250], %245 {strides = array<i32>} : memref<32x8xf32, #tpu.memory_space<vmem>>, vector<8x8xf32>,
    %c0_251 = arith.constant 0 : index
    %c0_252 = arith.constant 0 : index
    %247 = vector.load %arg9[%c0_251, %c0_252] : memref<32x8xf32, #tpu.memory_space<vmem>>, vector<32x8xf32>
    %c0_253 = arith.constant 0 : index
    %c0_254 = arith.constant 0 : index
    %248 = vector.load %arg10[%c0_253, %c0_254] : memref<32x8xf32, #tpu.memory_space<vmem>>, vector<32x8xf32>
    %c0_255 = arith.constant 0 : index
    %c0_256 = arith.constant 0 : index
    %249 = vector.load %arg11[%c0_255, %c0_256] : memref<32x8xf32, #tpu.memory_space<vmem>>, vector<32x8xf32>
    "tpu.trace_start"() <{level = 10 : i32, message = "pd,qd->pq"}> : () -> ()
    %cst_257 = arith.constant dense<0.000000e+00> : vector<32x32xf32>
    %250 = tpu.matmul %247, %248, %cst_257 {dimension_numbers = #tpu.dot_dimension_numbers<[1], [1], [0], [0], [0, 0, 1, 0], [], []>} : vector<32x8xf32>, vector<32x8xf32>, vector<32x32xf32> -> vector<32x32xf32>
    "tpu.trace_stop"() : () -> ()
    %c0_258 = arith.constant 0 : index
    %c0_259 = arith.constant 0 : index
    %251 = vector.load %arg7[%c0_258, %c0_259] : memref<32x32xf32, #tpu.memory_space<vmem>>, vector<32x32xf32>
    %252 = arith.addf %250, %251 : vector<32x32xf32>
    %cst_260 = arith.constant dense<0xFF800000> : vector<32xf32>
    %253 = vector.multi_reduction <maximumf>, %252, %cst_260 [1] : vector<32x32xf32> to vector<32xf32>
    %254 = vector.shape_cast %253 : vector<32xf32> to vector<32x1xf32>
    %255 = vector.broadcast %254 : vector<32x1xf32> to vector<32x32xf32>
    %256 = arith.subf %252, %255 : vector<32x32xf32>
    %257 = math.exp %256 : vector<32x32xf32>
    %cst_261 = arith.constant dense<0.000000e+00> : vector<32xf32>
    %258 = vector.multi_reduction <add>, %257, %cst_261 [1] : vector<32x32xf32> to vector<32xf32>
    %259 = vector.shape_cast %258 : vector<32xf32> to vector<32x1xf32>
    %260 = tpu.reciprocal %259 {approx = true} : vector<32x1xf32> -> vector<32x1xf32>
    %261 = arith.mulf %259, %260 : vector<32x1xf32>
    %cst_262 = arith.constant 2.000000e+00 : f32
    %262 = vector.broadcast %cst_262 : f32 to vector<32x1xf32>
    %263 = arith.subf %262, %261 : vector<32x1xf32>
    %264 = arith.mulf %260, %263 : vector<32x1xf32>
    %265 = vector.broadcast %264 : vector<32x1xf32> to vector<32x32xf32>
    %266 = arith.mulf %257, %265 : vector<32x32xf32>
    %cst_263 = arith.constant dense<0.000000e+00> : vector<32x8xf32>
    %267 = tpu.matmul %266, %249, %cst_263 {dimension_numbers = #tpu.dot_dimension_numbers<[1], [0], [0], [1], [0, 0, 1, 1], [], []>} : vector<32x32xf32>, vector<32x8xf32>, vector<32x8xf32> -> vector<32x8xf32>
    %268 = vector.extract_strided_slice %267 {offsets = [0, 0], sizes = [8, 8], strides = [1, 1]} : vector<32x8xf32> to vector<8x8xf32>
    %c0_264 = arith.constant 0 : index
    %c0_265 = arith.constant 0 : index
    %c0_266 = arith.constant 0 : index
    %269 = vector.load %arg6[%c0_264, %c0_265, %c0_266] : memref<4x8x32xf32, #tpu.memory_space<vmem>>, vector<1x8x32xf32>
    %270 = vector.shape_cast %269 : vector<1x8x32xf32> to vector<8x32xf32>
    %cst_267 = arith.constant dense<0.000000e+00> : vector<8x32xf32>
    %271 = tpu.matmul %268, %270, %cst_267 {dimension_numbers = #tpu.dot_dimension_numbers<[1], [0], [0], [1], [0, 0, 1, 1], [], []>} : vector<8x8xf32>, vector<8x32xf32>, vector<8x32xf32> -> vector<8x32xf32>
    %272 = vector.extract_strided_slice %267 {offsets = [8, 0], sizes = [8, 8], strides = [1, 1]} : vector<32x8xf32> to vector<8x8xf32>
    %c1_268 = arith.constant 1 : index
    %c0_269 = arith.constant 0 : index
    %c0_270 = arith.constant 0 : index
    %273 = vector.load %arg6[%c1_268, %c0_269, %c0_270] : memref<4x8x32xf32, #tpu.memory_space<vmem>>, vector<1x8x32xf32>
    %274 = vector.shape_cast %273 : vector<1x8x32xf32> to vector<8x32xf32>
    %cst_271 = arith.constant dense<0.000000e+00> : vector<8x32xf32>
    %275 = tpu.matmul %272, %274, %cst_271 {dimension_numbers = #tpu.dot_dimension_numbers<[1], [0], [0], [1], [0, 0, 1, 1], [], []>} : vector<8x8xf32>, vector<8x32xf32>, vector<8x32xf32> -> vector<8x32xf32>
    %276 = arith.addf %271, %275 : vector<8x32xf32>
    %277 = vector.extract_strided_slice %267 {offsets = [16, 0], sizes = [8, 8], strides = [1, 1]} : vector<32x8xf32> to vector<8x8xf32>
    %c2_272 = arith.constant 2 : index
    %c0_273 = arith.constant 0 : index
    %c0_274 = arith.constant 0 : index
    %278 = vector.load %arg6[%c2_272, %c0_273, %c0_274] : memref<4x8x32xf32, #tpu.memory_space<vmem>>, vector<1x8x32xf32>
    %279 = vector.shape_cast %278 : vector<1x8x32xf32> to vector<8x32xf32>
    %cst_275 = arith.constant dense<0.000000e+00> : vector<8x32xf32>
    %280 = tpu.matmul %277, %279, %cst_275 {dimension_numbers = #tpu.dot_dimension_numbers<[1], [0], [0], [1], [0, 0, 1, 1], [], []>} : vector<8x8xf32>, vector<8x32xf32>, vector<8x32xf32> -> vector<8x32xf32>
    %281 = arith.addf %276, %280 : vector<8x32xf32>
    %282 = vector.extract_strided_slice %267 {offsets = [24, 0], sizes = [8, 8], strides = [1, 1]} : vector<32x8xf32> to vector<8x8xf32>
    %c3_276 = arith.constant 3 : index
    %c0_277 = arith.constant 0 : index
    %c0_278 = arith.constant 0 : index
    %283 = vector.load %arg6[%c3_276, %c0_277, %c0_278] : memref<4x8x32xf32, #tpu.memory_space<vmem>>, vector<1x8x32xf32>
    %284 = vector.shape_cast %283 : vector<1x8x32xf32> to vector<8x32xf32>
    %cst_279 = arith.constant dense<0.000000e+00> : vector<8x32xf32>
    %285 = tpu.matmul %282, %284, %cst_279 {dimension_numbers = #tpu.dot_dimension_numbers<[1], [0], [0], [1], [0, 0, 1, 1], [], []>} : vector<8x8xf32>, vector<8x32xf32>, vector<8x32xf32> -> vector<8x32xf32>
    %286 = arith.addf %281, %285 : vector<8x32xf32>
    %c1_280 = arith.constant 1 : index
    %c0_281 = arith.constant 0 : index
    %c0_282 = arith.constant 0 : index
    %287 = vector.load %arg8[%c1_280, %c0_281, %c0_282] : memref<2x8x32xf32, #tpu.memory_space<vmem>>, vector<1x8x32xf32>
    %288 = vector.shape_cast %287 : vector<1x8x32xf32> to vector<8x32xf32>
    %289 = vector.shape_cast %286 : vector<8x32xf32> to vector<1x8x32xf32>
    tpu.vector_store %arg8[%c1_280, %c0_281, %c0_282], %289 {strides = array<i32>} : memref<2x8x32xf32, #tpu.memory_space<vmem>>, vector<1x8x32xf32>,
    return
  }
  func.func @transform_0(%arg0: i32) -> (i32, i32, i32) {
    %c0_i32 = arith.constant 0 : i32
    %c0_i32_0 = arith.constant 0 : i32
    %c0_i32_1 = arith.constant 0 : i32
    %c0_i32_2 = arith.constant 0 : i32
    return %c0_i32, %c0_i32_0, %c0_i32_1 : i32, i32, i32
  }
  func.func @transform_1(%arg0: i32) -> (i32, i32, i32) {
    %c0_i32 = arith.constant 0 : i32
    %c0_i32_0 = arith.constant 0 : i32
    %c0_i32_1 = arith.constant 0 : i32
    %c0_i32_2 = arith.constant 0 : i32
    return %c0_i32, %c0_i32_0, %c0_i32_1 : i32, i32, i32
  }
  func.func @transform_2(%arg0: i32) -> (i32, i32, i32) {
    %c0_i32 = arith.constant 0 : i32
    %c0_i32_0 = arith.constant 0 : i32
    %c0_i32_1 = arith.constant 0 : i32
    %c0_i32_2 = arith.constant 0 : i32
    return %c0_i32, %c0_i32_0, %c0_i32_1 : i32, i32, i32
  }
  func.func @transform_3(%arg0: i32) -> (i32, i32, i32) {
    %c0_i32 = arith.constant 0 : i32
    %c0_i32_0 = arith.constant 0 : i32
    %c0_i32_1 = arith.constant 0 : i32
    %c0_i32_2 = arith.constant 0 : i32
    return %c0_i32, %c0_i32_0, %c0_i32_1 : i32, i32, i32
  }
  func.func @transform_4(%arg0: i32) -> (i32, i32, i32) {
    %c0_i32 = arith.constant 0 : i32
    %c0_i32_0 = arith.constant 0 : i32
    %c0_i32_1 = arith.constant 0 : i32
    %c0_i32_2 = arith.constant 0 : i32
    return %c0_i32, %c0_i32_0, %c0_i32_1 : i32, i32, i32
  }
  func.func @transform_5(%arg0: i32) -> (i32, i32, i32) {
    %c0_i32 = arith.constant 0 : i32
    %c0_i32_0 = arith.constant 0 : i32
    %c0_i32_1 = arith.constant 0 : i32
    %c0_i32_2 = arith.constant 0 : i32
    return %c0_i32, %c0_i32_0, %c0_i32_1 : i32, i32, i32
  }
  func.func @transform_6(%arg0: i32) -> (i32, i32) {
    %c0_i32 = arith.constant 0 : i32
    %c0_i32_0 = arith.constant 0 : i32
    %c0_i32_1 = arith.constant 0 : i32
    return %c0_i32, %c0_i32_0 : i32, i32
  }
  func.func @transform_7(%arg0: i32) -> (i32, i32, i32) {
    %c0_i32 = arith.constant 0 : i32
    %c0_i32_0 = arith.constant 0 : i32
    %c0_i32_1 = arith.constant 0 : i32
    %c0_i32_2 = arith.constant 0 : i32
    return %c0_i32, %c0_i32_0, %c0_i32_1 : i32, i32, i32
  }
}

</mosaic_0001>

<bundles_post_ra>
// kernel: mha_forward.1
= control target key start
LH: loop header
LB: loop body
LE: loop exit
PB: predicated region body
PF: predicated region fallthrough
CT: control target
= control target key end

     0   :  { %v4866_v2 = vmov 0.0   ;;  %vm41_vm0 = vcmask 261120   ;;  %vm4007_vm1 = vmmov 0   ;;  %s4858_s0 = inlined_call_operand.vmem [shape: f32[2,8,32], index: 0, kind: input, shape index: {}]   ;;  %s4859_s1 = inlined_call_operand.vmem [shape: f32[2,8,32], index: 1, kind: input, shape index: {}]   ;;  %s4860_s2 = inlined_call_operand.vmem [shape: f32[2,8,32], index: 2, kind: input, shape index: {}]   ;;  %s4861_s3 = inlined_call_operand.vmem [shape: f32[12,32,8], index: 3, kind: input, shape index: {}]   ;;  %s4862_s4 = inlined_call_operand.vmem [shape: f32[12,1,8], index: 4, kind: input, shape index: {}]   ;;  %s4863_s5 = inlined_call_operand.vmem [shape: f32[4,8,32], index: 5, kind: input, shape index: {}]   ;;  %s4864_s6 = inlined_call_operand.vmem [shape: f32[32,32], index: 6, kind: input, shape index: {}]   ;;  %s4865_s7 = inlined_call_operand.hbm [shape: f32[2,8,32], index: 7, kind: output, shape index: {}]  }
   0x1   :  { %v4054_v0 = vld [vmem:[%s4861_s3 + $0x18] sm:$0xff]  ;;  %3587 = vmatprep.subr.mxu0 %v4866_v2  ;;  %3598 = vmatprep.subr.mxu1 %v4866_v2  ;;  %v4066_v3 = vld [vmem:[%s4861_s3 + $0x10] sm:$0xff]  ;;  %v4080_v5 = vld [vmem:[%s4861_s3 + $0x8] sm:$0xff] }
   0x2   :  { %v4059_v1 = vld [vmem:[%s4861_s3 + $0x98] sm:$0xff]  ;;  %v4071_v4 = vld [vmem:[%s4861_s3 + $0x90] sm:$0xff]  ;;  %3588 = vmatpush3.msra.mxu0 %v4054_v0  ;;  %v4085_v6 = vld [vmem:[%s4861_s3 + $0x88] sm:$0xff]  ;;  %3595 = vmatprep.mubr.msk.f32.mxu0 %vm4007_vm1, %v4866_v2 }
   0x3   :  { %3599 = vmatpush3.msra.mxu1 %v4059_v1  ;;  %3589 = vmatprep.subr.mxu0 %v4866_v2  ;;  %v4094_v7 = vld [vmem:[%s4861_s3] sm:$0xff]  ;;  %v4124_v11 = vld [vmem:[%s4861_s3 + $0x118] sm:$0xff]  ;;  %v4140_v13 = vld [vmem:[%s4861_s3 + $0x110] sm:$0xff] }
   0x4   :  { %3600 = vmatprep.subr.mxu1 %v4866_v2  ;;  %3590 = vmatpush3.msra.mxu0 %v4066_v3  ;;  %v4101_v8 = vld [vmem:[%s4861_s3 + $0x80] sm:$0xff]  ;;  %v4129_v12 = vld [vmem:[%s4861_s3 + $0x38] sm:$0xff]  ;;  %v4145_v14 = vld [vmem:[%s4861_s3 + $0x30] sm:$0xff] }
   0x5   :  { %3601 = vmatpush3.msra.mxu1 %v4071_v4  ;;  %3591 = vmatprep.subr.mxu0 %v4866_v2  ;;  %v4106_v9 = vld [vmem:[%s4858_s0] sm:$0xff]  ;;  %v4154_v15 = vld [vmem:[%s4861_s3 + $0x108] sm:$0xff] }
   0x6   :  { %3602 = vmatprep.subr.mxu1 %v4866_v2  ;;  %3592 = vmatpush3.msra.mxu0 %v4080_v5  ;;  %v4116_v10 = vld [vmem:[%s4859_s1] sm:$0xff]  ;;  %v4159_v16 = vld [vmem:[%s4861_s3 + $0x28] sm:$0xff] }
   0x7   :  { %3603 = vmatpush3.msra.mxu1 %v4085_v6  ;;  %3593 = vmatprep.subr.mxu0 %v4866_v2  ;;  %v4168_v17 = vld [vmem:[%s4861_s3 + $0x100] sm:$0xff] }
   0x8   :  { %3604 = vmatprep.subr.mxu1 %v4866_v2  ;;  %3594 = vmatpush3.msra.mxu0 %v4094_v7  ;;  %v4175_v18 = vld [vmem:[%s4861_s3 + $0x20] sm:$0xff] }
   0x9   :  { %3605 = vmatpush3.msra.mxu1 %v4101_v8  ;;  %3596 = vmatmul.mubr.msk.f32.vlgmr.msra.gmra.mxu0 %vm41_vm0, %v4106_v9  ;;  %v4180_v19 = vld [vmem:[%s4860_s2] sm:$0xff] }
   0xa   :  { %3606 = vmatprep.mubr.msk.f32.mxu1 %vm4007_vm1, %v4866_v2  ;;  %3609 = vmatprep.subr.mxu0 %v4866_v2 }
   0xb   :  { %3620 = vmatprep.subr.mxu1 %v4866_v2  ;;  %3607 = vmatmul.mubr.msk.f32.vlgmr.msra.gmra.mxu1 %vm41_vm0, %v4116_v10 }
   0xc   :  { %3610 = vmatpush3.msra.mxu0 %v4124_v11  ;;  %3621 = vmatpush3.msra.mxu1 %v4129_v12 }
   0xd   :  { %3611 = vmatprep.subr.mxu0 %v4866_v2  ;;  %3622 = vmatprep.subr.mxu1 %v4866_v2 }
   0xe   :  { %3612 = vmatpush3.msra.mxu0 %v4140_v13  ;;  %3623 = vmatpush3.msra.mxu1 %v4145_v14 }
   0xf   :  { %3613 = vmatprep.subr.mxu0 %v4866_v2  ;;  %3624 = vmatprep.subr.mxu1 %v4866_v2 }
  0x10   :  { %3614 = vmatpush3.msra.mxu0 %v4154_v15  ;;  %3625 = vmatpush3.msra.mxu1 %v4159_v16 }
  0x11   :  { %3615 = vmatprep.subr.mxu0 %v4866_v2  ;;  %3626 = vmatprep.subr.mxu1 %v4866_v2 }
  0x12   :  { %12 = vsyncpa [#allocation6], 0  ;;  %3616 = vmatpush3.msra.mxu0 %v4168_v17  ;;  %3617 = vmatprep.mubr.msk.f32.mxu0 %vm4007_vm1, %v4866_v2  ;;  %v4193_v20 = vld [vmem:[%s4861_s3 + $0xb8] sm:$0xff]  ;;  %v4209_v22 = vld [vmem:[%s4861_s3 + $0xb0] sm:$0xff]  ;;  %vm115_vm2 = vcmask 64512  }
  0x13   :  { %3627 = vmatpush3.msra.mxu1 %v4175_v18  ;;  %3618 = vmatmul.mubr.msk.f32.vlgmr.msra.gmra.mxu0 %vm41_vm0, %v4180_v19  ;;  %v4198_v21 = vld [vmem:[%s4861_s3 + $0x138] sm:$0xff]  ;;  %v4214_v23 = vld [vmem:[%s4861_s3 + $0x130] sm:$0xff]  ;;  %v4223_v24 = vld [vmem:[%s4861_s3 + $0xa8] sm:$0xff] }
  0x14   :  { %3628 = vmatprep.mubr.msk.f32.mxu1 %vm4007_vm1, %v4866_v2  ;;  %3631 = vmatprep.subr.mxu0 %v4866_v2  ;;  %v4228_v25 = vld [vmem:[%s4861_s3 + $0x128] sm:$0xff]  ;;  %v4237_v26 = vld [vmem:[%s4861_s3 + $0xa0] sm:$0xff]  ;;  %v4257_v28 = vld [vmem:[%s4861_s3 + $0x58] sm:$0xff] }
  0x15   :  { %3642 = vmatprep.subr.mxu1 %v4866_v2  ;;  %3629 = vmatmul.mubr.msk.f32.vlgmr.msra.gmra.mxu1 %vm41_vm0, %v4106_v9  ;;  %v4244_v27 = vld [vmem:[%s4861_s3 + $0x120] sm:$0xff]  ;;  %v4262_v29 = vld [vmem:[%s4861_s3 + $0xd8] sm:$0xff]  ;;  %v4273_v30 = vld [vmem:[%s4861_s3 + $0x50] sm:$0xff] }
  0x16   :  { %3632 = vmatpush3.msra.mxu0 %v4193_v20  ;;  %3643 = vmatpush3.msra.mxu1 %v4198_v21  ;;  %v4278_v31 = vld [vmem:[%s4861_s3 + $0xd0] sm:$0xff]  ;;  %v4287_v32 = vld [vmem:[%s4861_s3 + $0x48] sm:$0xff]  ;;  %v4301_v34 = vld [vmem:[%s4861_s3 + $0x40] sm:$0xff] }
  0x17   :  { %3633 = vmatprep.subr.mxu0 %v4866_v2  ;;  %3644 = vmatprep.subr.mxu1 %v4866_v2  ;;  %v4292_v33 = vld [vmem:[%s4861_s3 + $0xc8] sm:$0xff]  ;;  %v4308_v35 = vld [vmem:[%s4861_s3 + $0xc0] sm:$0xff]  ;;  %v4321_v36 = vld [vmem:[%s4861_s3 + $0x158] sm:$0xff] }
  0x18   :  { %3634 = vmatpush3.msra.mxu0 %v4209_v22  ;;  %3645 = vmatpush3.msra.mxu1 %v4214_v23  ;;  %v4326_v37 = vld [vmem:[%s4861_s3 + $0x78] sm:$0xff]  ;;  %v4337_v38 = vld [vmem:[%s4861_s3 + $0x150] sm:$0xff]  ;;  %v4351_v40 = vld [vmem:[%s4861_s3 + $0x148] sm:$0xff] }
  0x19   :  { %3635 = vmatprep.subr.mxu0 %v4866_v2  ;;  %3646 = vmatprep.subr.mxu1 %v4866_v2  ;;  %v4342_v39 = vld [vmem:[%s4861_s3 + $0x70] sm:$0xff]  ;;  %v4356_v41 = vld [vmem:[%s4861_s3 + $0x68] sm:$0xff]  ;;  %v4365_v42 = vld [vmem:[%s4861_s3 + $0x140] sm:$0xff] }
  0x1a   :  { %3636 = vmatpush3.msra.mxu0 %v4223_v24  ;;  %3647 = vmatpush3.msra.mxu1 %v4228_v25  ;;  %4897 = vst [vmem:[#allocation8_spill] sm:$0xff] %v4342_v39  ;;  %4898 = vst [vmem:[#allocation9_spill] sm:$0xff] %v4356_v41  ;;  %v4372_v43 = vld [vmem:[%s4861_s3 + $0x60] sm:$0xff]  ;;  %v4385_v44 = vld [vmem:[%s4861_s3 + $0xf8] sm:$0xff] }
  0x1b   :  { %3637 = vmatprep.subr.mxu0 %v4866_v2  ;;  %3648 = vmatprep.subr.mxu1 %v4866_v2  ;;  %4899 = vst [vmem:[#allocation10_spill] sm:$0xff] %v4365_v42  ;;  %4900 = vst [vmem:[#allocation11_spill] sm:$0xff] %v4372_v43  ;;  %v4390_v45 = vld [vmem:[%s4861_s3 + $0x178] sm:$0xff]  ;;  %v4401_v46 = vld [vmem:[%s4861_s3 + $0xf0] sm:$0xff] }
  0x1c   :  { %3638 = vmatpush3.msra.mxu0 %v4237_v26  ;;  %3639 = vmatprep.mubr.msk.f32.mxu0 %vm4007_vm1, %v4866_v2  ;;  %4901 = vst [vmem:[#allocation12_spill] sm:$0xff] %v4385_v44  ;;  %4902 = vst [vmem:[#allocation13_spill] sm:$0xff] %v4390_v45  ;;  %v4406_v47 = vld [vmem:[%s4861_s3 + $0x170] sm:$0xff]  ;;  %v4415_v48 = vld [vmem:[%s4861_s3 + $0xe8] sm:$0xff] }
  0x1d   :  { %3649 = vmatpush3.msra.mxu1 %v4244_v27  ;;  %3640 = vmatmul.mubr.msk.f32.vlgmr.msra.gmra.mxu0 %vm41_vm0, %v4116_v10  ;;  %4903 = vst [vmem:[#allocation14_spill] sm:$0xff] %v4401_v46  ;;  %4904 = vst [vmem:[#allocation15_spill] sm:$0xff] %v4406_v47  ;;  %v4420_v49 = vld [vmem:[%s4861_s3 + $0x168] sm:$0xff]  ;;  %v4429_v50 = vld [vmem:[%s4861_s3 + $0xe0] sm:$0xff] }
  0x1e   :  { %3650 = vmatprep.mubr.msk.f32.mxu1 %vm4007_vm1, %v4866_v2  ;;  %3653 = vmatprep.subr.mxu0 %v4866_v2  ;;  %4905 = vst [vmem:[#allocation16_spill] sm:$0xff] %v4415_v48  ;;  %4906 = vst [vmem:[#allocation17_spill] sm:$0xff] %v4420_v49  ;;  %v4436_v51 = vld [vmem:[%s4861_s3 + $0x160] sm:$0xff]  ;;  %v4467_v60 = vld [vmem:[%s4862_s4 + $0x8] ss:$0 sm:$0xff] }
  0x1f   :  { %3664 = vmatprep.subr.mxu1 %v4866_v2  ;;  %3651 = vmatmul.mubr.msk.f32.vlgmr.msra.gmra.mxu1 %vm41_vm0, %v4180_v19  ;;  %4907 = vst [vmem:[#allocation18_spill] sm:$0xff] %v4429_v50  ;;  %4908 = vst [vmem:[#allocation19_spill] sm:$0xff] %v4436_v51  ;;  %v4453_v52 = vld [vmem:[%s4862_s4] ss:$0 sm:$0xff]  ;;  %v4458_v54 = vld [vmem:[%s4862_s4 + $0x4] ss:$0 sm:$0xff] }
  0x20   :  { %3654 = vmatpush3.msra.mxu0 %v4257_v28  ;;  %3665 = vmatpush3.msra.mxu1 %v4262_v29  ;;  %4909 = vst [vmem:[#allocation20_spill] sm:$0xff] %v4453_v52  ;;  %4910 = vst [vmem:[#allocation21_spill] sm:$0xff] %v4458_v54  ;;  %v4472_v63 = vld [vmem:[%s4862_s4 + $0x1] ss:$0 sm:$0xff] }
  0x21   :  { %3655 = vmatprep.subr.mxu0 %v4866_v2  ;;  %3666 = vmatprep.subr.mxu1 %v4866_v2  ;;  %4911 = vst [vmem:[#allocation22_spill] sm:$0xff] %v4467_v60  ;;  %4912 = vst [vmem:[#allocation23_spill] sm:$0xff] %v4472_v63 }
  0x22   :  { %3656 = vmatpush3.msra.mxu0 %v4273_v30  ;;  %3667 = vmatpush3.msra.mxu1 %v4278_v31 }
  0x23   :  { %3657 = vmatprep.subr.mxu0 %v4866_v2  ;;  %3668 = vmatprep.subr.mxu1 %v4866_v2 }
  0x24   :  { %3658 = vmatpush3.msra.mxu0 %v4287_v32  ;;  %3669 = vmatpush3.msra.mxu1 %v4292_v33 }
  0x25   :  { %3659 = vmatprep.subr.mxu0 %v4866_v2  ;;  %3670 = vmatprep.subr.mxu1 %v4866_v2 }
  0x26   :  { %3660 = vmatpush3.msra.mxu0 %v4301_v34  ;;  %3661 = vmatprep.mubr.msk.f32.mxu0 %vm4007_vm1, %v4866_v2 }
  0x27   :  { %3671 = vmatpush3.msra.mxu1 %v4308_v35  ;;  %3662 = vmatmul.mubr.msk.f32.vlgmr.msra.gmra.mxu0 %vm41_vm0, %v4106_v9 }
  0x28   :  { %3672 = vmatprep.mubr.msk.f32.mxu1 %vm4007_vm1, %v4866_v2  ;;  %3675 = vmatprep.subr.mxu0 %v4866_v2 }
  0x29   :  { %3686 = vmatprep.subr.mxu1 %v4866_v2  ;;  %3673 = vmatmul.mubr.msk.f32.vlgmr.msra.gmra.mxu1 %vm41_vm0, %v4116_v10 }
  0x2a   :  { %3676 = vmatpush3.msra.mxu0 %v4321_v36  ;;  %3687 = vmatpush3.msra.mxu1 %v4326_v37 }
  0x2b   :  { %3677 = vmatprep.subr.mxu0 %v4866_v2  ;;  %3688 = vmatprep.subr.mxu1 %v4866_v2 }
  0x2c   :  { %3678 = vmatpush3.msra.mxu0 %v4337_v38  ;;  %3689 = vmatpush3.msra.mxu1 %v4342_v39 }
  0x2d   :  { %3679 = vmatprep.subr.mxu0 %v4866_v2  ;;  %3690 = vmatprep.subr.mxu1 %v4866_v2 }
  0x2e   :  { %3680 = vmatpush3.msra.mxu0 %v4351_v40  ;;  %3691 = vmatpush3.msra.mxu1 %v4356_v41 }
  0x2f   :  { %3681 = vmatprep.subr.mxu0 %v4866_v2  ;;  %3692 = vmatprep.subr.mxu1 %v4866_v2 }
  0x30   :  { %3682 = vmatpush3.msra.mxu0 %v4365_v42  ;;  %3683 = vmatprep.mubr.msk.f32.mxu0 %vm4007_vm1, %v4866_v2 }
  0x31   :  { %3693 = vmatpush3.msra.mxu1 %v4372_v43  ;;  %3684 = vmatmul.mubr.msk.f32.vlgmr.msra.gmra.mxu0 %vm41_vm0, %v4180_v19 }
  0x32   :  { %3694 = vmatprep.mubr.msk.f32.mxu1 %vm4007_vm1, %v4866_v2  ;;  %3697 = vmatprep.subr.mxu0 %v4866_v2 }
  0x33   :  { %3708 = vmatprep.subr.mxu1 %v4866_v2  ;;  %3695 = vmatmul.mubr.msk.f32.vlgmr.msra.gmra.mxu1 %vm41_vm0, %v4106_v9 }
  0x34   :  { %3698 = vmatpush3.msra.mxu0 %v4385_v44  ;;  %3709 = vmatpush3.msra.mxu1 %v4390_v45 }
  0x35   :  { %3699 = vmatprep.subr.mxu0 %v4866_v2  ;;  %3710 = vmatprep.subr.mxu1 %v4866_v2 }
  0x36   :  { %3700 = vmatpush3.msra.mxu0 %v4401_v46  ;;  %3711 = vmatpush3.msra.mxu1 %v4406_v47 }
  0x37   :  { %3701 = vmatprep.subr.mxu0 %v4866_v2  ;;  %3712 = vmatprep.subr.mxu1 %v4866_v2 }
  0x38   :  { %3702 = vmatpush3.msra.mxu0 %v4415_v48  ;;  %3713 = vmatpush3.msra.mxu1 %v4420_v49 }
  0x39   :  { %3703 = vmatprep.subr.mxu0 %v4866_v2  ;;  %3714 = vmatprep.subr.mxu1 %v4866_v2 }
  0x3a   :  { %3704 = vmatpush3.msra.mxu0 %v4429_v50  ;;  %3705 = vmatprep.mubr.msk.f32.mxu0 %vm4007_vm1, %v4866_v2 }
  0x3b   :  { %3715 = vmatpush3.msra.mxu1 %v4436_v51  ;;  %3716 = vmatprep.mubr.msk.f32.mxu1 %vm4007_vm1, %v4866_v2 }
  0x3c   :  { %3706 = vmatmul.mubr.msk.f32.vlgmr.msra.gmra.mxu0 %vm41_vm0, %v4116_v10  ;;  %3717 = vmatmul.mubr.msk.f32.vlgmr.msra.gmra.mxu1 %vm41_vm0, %v4180_v19 }
  0xc9   :  { %v111_v53 = vpop.f32.mrf.mxu0 }
  0xca   :  { %v112_v55 = vadd.f32 %v4453_v52, %v111_v53 }
  0xcb   :  { %v3597_v56 = vpop.f32.mrf.mxu0  ;;  %v199_v57 = vpop.f32.mrf.mxu1 }
  0xcc   :  { %116 = vst.msk [vmem:[#allocation2] sm:$0xff] %vm115_vm2, %v112_v55  ;;  %v200_v58 = vadd.f32 %v4458_v54, %v199_v57  ;;  %v4482_v56 = vld [vmem:[%s4862_s4 + $0x5] ss:$0 sm:$0xff] }
  0xcd   :  { %v3608_v59 = vpop.f32.mrf.mxu1  ;;  %4913 = vst [vmem:[#allocation24_spill] sm:$0xff] %v4482_v56 }
  0xce   :  { %203 = vst.msk [vmem:[#allocation3] sm:$0xff] %vm115_vm2, %v200_v58  ;;  %v4487_v58 = vld [vmem:[%s4862_s4 + $0x9] ss:$0 sm:$0xff] }
  0xcf   :  { %4914 = vst [vmem:[#allocation25_spill] sm:$0xff] %v4487_v58 }
  0xd3   :  { %v286_v61 = vpop.f32.mrf.mxu0  ;;  %v1047_v62 = vld [vmem:[#allocation2] sm:$0xff] }
  0xd4   :  { %v287_v9 = vadd.f32 %v4467_v60, %v286_v61  ;;  %3727 = vmatprep.mubr.msk.f32.mxu0 %vm115_vm2, %v1047_v62 }
  0xd5   :  { %v3619_v10 = vpop.f32.mrf.mxu0  ;;  %v370_v19 = vpop.f32.mrf.mxu1 }
  0xd6   :  { %290 = vst.msk [vmem:[#allocation4] sm:$0xff] %vm115_vm2, %v287_v9  ;;  %v371_v53 = vadd.f32 %v4472_v63, %v370_v19  ;;  %v4496_v19 = vld [vmem:[%s4862_s4 + $0x2] ss:$0 sm:$0xff] }
  0xd7   :  { %v3630_v55 = vpop.f32.mrf.mxu1  ;;  %4915 = vst [vmem:[#allocation26_spill] sm:$0xff] %v4496_v19 }
  0xd8   :  { %374 = vst.msk [vmem:[#allocation2 + $0x8] sm:$0xff] %vm115_vm2, %v371_v53  ;;  %v4501_v55 = vld [vmem:[%s4862_s4 + $0x6] ss:$0 sm:$0xff] }
  0xd9   :  { %4916 = vst [vmem:[#allocation27_spill] sm:$0xff] %v4501_v55 }
  0xdd   :  { %v454_v57 = vpop.f32.mrf.mxu0 }
  0xde   :  { %v455_v59 = vadd.f32 %v4482_v56, %v454_v57 }
  0xdf   :  { %v3641_v61 = vpop.f32.mrf.mxu0  ;;  %v538_v62 = vpop.f32.mrf.mxu1 }
  0xe0   :  { %458 = vst.msk [vmem:[#allocation3 + $0x8] sm:$0xff] %vm115_vm2, %v455_v59  ;;  %v539_v9 = vadd.f32 %v4487_v58, %v538_v62  ;;  %v4515_v58 = vld [vmem:[%s4862_s4 + $0x3] ss:$0 sm:$0xff] }
  0xe1   :  { %v3652_v10 = vpop.f32.mrf.mxu1  ;;  %4918 = vst [vmem:[#allocation29_spill] sm:$0xff] %v4515_v58 }
  0xe2   :  { %542 = vst.msk [vmem:[#allocation4 + $0x8] sm:$0xff] %vm115_vm2, %v539_v9  ;;  %v4510_v10 = vld [vmem:[%s4862_s4 + $0xa] ss:$0 sm:$0xff] }
  0xe3   :  { %4917 = vst [vmem:[#allocation28_spill] sm:$0xff] %v4510_v10 }
  0xe7   :  { %v622_v53 = vpop.f32.mrf.mxu0 }
  0xe8   :  { %v623_v57 = vadd.f32 %v4496_v19, %v622_v53 }
  0xe9   :  { %v3663_v61 = vpop.f32.mrf.mxu0  ;;  %v706_v59 = vpop.f32.mrf.mxu1 }
  0xea   :  { %626 = vst.msk [vmem:[#allocation2 + $0x10] sm:$0xff] %vm115_vm2, %v623_v57  ;;  %v707_v62 = vadd.f32 %v4501_v55, %v706_v59  ;;  %v4529_v55 = vld [vmem:[%s4862_s4 + $0xb] ss:$0 sm:$0xff] }
  0xeb   :  { %v3674_v9 = vpop.f32.mrf.mxu1  ;;  %4920 = vst [vmem:[#allocation31_spill] sm:$0xff] %v4529_v55 }
  0xec   :  { %710 = vst.msk [vmem:[#allocation3 + $0x10] sm:$0xff] %vm115_vm2, %v707_v62  ;;  %v4524_v9 = vld [vmem:[%s4862_s4 + $0x7] ss:$0 sm:$0xff] }
  0xed   :  { %4919 = vst [vmem:[#allocation30_spill] sm:$0xff] %v4524_v9 }
  0xf1   :  { %v790_v2 = vpop.f32.mrf.mxu0 }
  0xf2   :  { %v791_v53 = vadd.f32 %v4510_v10, %v790_v2 }
  0xf3   :  { %v3685_v61 = vpop.f32.mrf.mxu0  ;;  %v874_v57 = vpop.f32.mrf.mxu1  ;;  %v1053_v19 = vld [vmem:[#allocation3 + $0x10] sm:$0xff] }
  0xf4   :  { %794 = vst.msk [vmem:[#allocation4 + $0x10] sm:$0xff] %vm115_vm2, %v791_v53  ;;  %v875_v59 = vadd.f32 %v4515_v58, %v874_v57 }
  0xf5   :  { %v3696_v62 = vpop.f32.mrf.mxu1 }
  0xf6   :  { %878 = vst.msk [vmem:[#allocation2 + $0x18] sm:$0xff] %vm115_vm2, %v875_v59 }
  0xfb   :  { %v1057_v56 = vld [vmem:[#allocation4 + $0x10] sm:$0xff] }
  0xfc   :  { %v958_v2 = vpop.f32.mrf.mxu0  ;;  %v1042_v61 = vpop.f32.mrf.mxu1 }
  0xfd   :  { %v959_v10 = vadd.f32 %v4524_v9, %v958_v2  ;;  %v1043_v53 = vadd.f32 %v4529_v55, %v1042_v61  ;;  %v1056_v2 = vld [vmem:[#allocation4 + $0x8] sm:$0xff]  ;;  %v1055_v61 = vld [vmem:[#allocation4] sm:$0xff]  ;;  %v4571_v55 = vld [vmem:[%s4864_s6 + $0x18] sm:$0xff] }
  0xfe   :  { %v3707_v57 = vpop.f32.mrf.mxu0  ;;  %v3718_v62 = vpop.f32.mrf.mxu1  ;;  %4925 = vst [vmem:[#allocation35_spill] sm:$0xff] %v4571_v55 }
  0xff   :  { %962 = vst.msk [vmem:[#allocation3 + $0x18] sm:$0xff] %vm115_vm2, %v959_v10  ;;  %1046 = vst.msk [vmem:[#allocation4 + $0x18] sm:$0xff] %vm115_vm2, %v1043_v53  ;;  %v1052_v10 = vld [vmem:[#allocation3 + $0x8] sm:$0xff]  ;;  %v4921_v53 = vmov 0.0   ;;  %v1050_v57 = vld [vmem:[#allocation2 + $0x18] sm:$0xff] }
 0x106   :  { %v1054_v59 = vld [vmem:[#allocation3 + $0x18] sm:$0xff] }
 0x107   :  { %v1058_v58 = vld [vmem:[#allocation4 + $0x18] sm:$0xff]  ;;  %3719 = vmatprep.subr.msk.mxu0 %vm115_vm2, %v1054_v59 }
 0x108   :  { %3733 = vmatprep.subr.mxu1 %v1058_v58  ;;  %3720 = vmatpush3.xpose.msk.msra.mxu0 %vm115_vm2, %v1054_v59  ;;  %v4553_v59 = vld [vmem:[%s4864_s6] sm:$0xff] }
 0x109   :  { %3734 = vmatpush3.msra.mxu1 %v1058_v58  ;;  %3721 = vmatprep.subr.msk.mxu0 %vm115_vm2, %v1053_v19  ;;  %v1051_v58 = vld [vmem:[#allocation3] sm:$0xff]  ;;  %4922 = vst [vmem:[#allocation32_spill] sm:$0xff] %v4553_v59 }
 0x10a   :  { %3735 = vmatprep.subr.mxu1 %v1057_v56 }
 0x10b   :  { %3736 = vmatpush3.msra.mxu1 %v1057_v56  ;;  %v1048_v56 = vld [vmem:[#allocation2 + $0x8] sm:$0xff] }
 0x10c   :  { %3737 = vmatprep.subr.mxu1 %v1056_v2  ;;  %3722 = vmatpush3.xpose.msk.msra.mxu0 %vm115_vm2, %v1053_v19  ;;  %v1049_v19 = vld [vmem:[#allocation2 + $0x10] sm:$0xff] }
 0x10d   :  { %3738 = vmatpush3.msra.mxu1 %v1056_v2  ;;  %3723 = vmatprep.subr.msk.mxu0 %vm115_vm2, %v1052_v10  ;;  %v4558_v2 = vld [vmem:[%s4864_s6 + $0x8] sm:$0xff] }
 0x10e   :  { %3739 = vmatprep.subr.mxu1 %v1055_v61  ;;  %4923 = vst [vmem:[#allocation33_spill] sm:$0xff] %v4558_v2 }
 0x10f   :  { %3740 = vmatpush3.msra.mxu1 %v1055_v61 }
 0x110   :  { %3747 = vmatprep.subr.mxu1 %v4921_v53  ;;  %3724 = vmatpush3.xpose.msk.msra.mxu0 %vm115_vm2, %v1052_v10 }
 0x111   :  { %3725 = vmatprep.subr.msk.mxu0 %vm115_vm2, %v1051_v58 }
 0x114   :  { %3726 = vmatpush3.xpose.msk.msra.mxu0 %vm115_vm2, %v1051_v58 }
 0x115   :  { %3757 = vmatprep.subr.mxu0 %v4921_v53 }
 0x117   :  { %3728 = vmatmul.mubr.msk.f32.vlgmr.msra.gmra.mxu0 %vm115_vm2, %v1048_v56  ;;  %v4564_v56 = vld [vmem:[%s4864_s6 + $0x10] sm:$0xff] }
 0x118   :  { %3730 = vmatprep.mubr.msk.f32.mxu0 %vm115_vm2, %v1049_v19  ;;  %4924 = vst [vmem:[#allocation34_spill] sm:$0xff] %v4564_v56 }
 0x11b   :  { %3731 = vmatmul.mubr.msk.f32.gmra.mxu0 %vm115_vm2, %v1050_v57 }
 0x11c   :  { %3759 = vmatprep.mubr.msk.f32.mxu0 %vm4007_vm1, %v4921_v53 }
 0x1d7   :  { %v3729_v62 = vpop.f32.mrf.mxu0 }
 0x1d8   :  { %v1159_v19 = vadd.f32 %v3729_v62, %v4558_v2 }
 0x1d9   :  { %v1153_v10 = vpop.f32.mrf.mxu0 }
 0x1da   :  { %v1154_v61 = vadd.f32 %v1153_v10, %v4553_v59  ;;  %v1175_v60 = vsel %vm41_vm0, %v1159_v19, -inf }
 0x1db   :  { %v3732_v58 = vpop.f32.mrf.mxu0 }
 0x1dc   :  { %v1172_v57 = vsel %vm41_vm0, %v1154_v61, -inf  ;;  %v1169_v10 = vadd.f32 %v3732_v58, %v4571_v55 }
 0x1dd   :  { %v1163_v9 = vpop.f32.mrf.mxu0  ;;  %1173 = vmax.xlane.f32.xlu0 %v1172_v57 }
 0x1de   :  { %v1164_v63 = vadd.f32 %v1163_v9, %v4564_v56  ;;  %v1181_v62 = vsel %vm41_vm0, %v1169_v10, -inf }
 0x1e0   :  { %v1178_v59 = vsel %vm41_vm0, %v1164_v63, -inf }
 0x1e1   :  { %1179 = vmax.xlane.f32.xlu1 %v1178_v59  ;;  %1176 = vmax.xlane.f32.xlu0 %v1175_v60 }
 0x1e5   :  { %1182 = vmax.xlane.f32.xlu1 %v1181_v62 }
 0x266   :  { %v1174_v2 = vpop.xlane.xlu0 %1173 }
 0x267   :  { %v1184_v54 = vsub.f32 %v1154_v61, %v1174_v2 }
 0x269   :  { %v1188_v52 = vmul.f32 1.442695, %v1184_v54 }
 0x26a   :  { %v1180_v51 = vpop.xlane.xlu1 %1179  ;;  %v1177_v49 = vpop.xlane.xlu0 %1176 }
 0x26b   :  { %3952 = vpow2.f32 %v1188_v52  ;;  %v1186_v57 = vsub.f32 %v1164_v63, %v1180_v51  ;;  %v1185_v50 = vsub.f32 %v1159_v19, %v1177_v49 }
 0x26d   :  { %v1192_v9 = vmul.f32 1.442695, %v1186_v57  ;;  %v1190_v56 = vmul.f32 1.442695, %v1185_v50 }
 0x26e   :  { %v1183_v58 = vpop.xlane.xlu1 %1182 }
 0x26f   :  { %3954 = vpow2.f32 %v1192_v9  ;;  %v1187_v55 = vsub.f32 %v1169_v10, %v1183_v58 }
 0x270   :  { %3956 = vpow2.f32 %v1190_v56 }
 0x271   :  { %v1194_v47 = vmul.f32 1.442695, %v1187_v55 }
 0x273   :  { %3958 = vpow2.f32 %v1194_v47  ;;  %v4585_v47 = vld [vmem:[%s4863_s5 + $0x10] sm:$0xff] }
 0x274   :  { %4926 = vst [vmem:[#allocation36_spill] sm:$0xff] %v4585_v47  ;;  %3758 = vmatpush3.msra.mxu0 %v4585_v47 }
 0x275   :  { %3767 = vmatprep.subr.mxu0 %v4921_v53 }
 0x278   :  { %v3953_v60 = vpop.eup %3952 }
 0x279   :  { %v1196_v59 = vsel %vm41_vm0, %v3953_v60, 0.0 }
 0x27a   :  { %1197 = vadd.xlane.f32.xlu0 %v1196_v59 }
 0x27c   :  { %v3955_v62 = vpop.eup %3954 }
 0x27d   :  { %v3957_v2 = vpop.eup %3956  ;;  %v1202_v54 = vsel %vm41_vm0, %v3955_v62, 0.0 }
 0x27e   :  { %1203 = vadd.xlane.f32.xlu0 %v1202_v54  ;;  %v1199_v51 = vsel %vm41_vm0, %v3957_v2, 0.0 }
 0x27f   :  { %1200 = vadd.xlane.f32.xlu1 %v1199_v51 }
 0x280   :  { %v3959_v49 = vpop.eup %3958 }
 0x281   :  { %v1205_v50 = vsel %vm41_vm0, %v3959_v49, 0.0 }
 0x283   :  { %1206 = vadd.xlane.f32.xlu1 %v1205_v50 }
 0x303   :  { %v1198_v52 = vpop.xlane.xlu0 %1197 }
 0x304   :  { %3960 = vrcp.f32 %v1198_v52 }
 0x307   :  { %v1204_v63 = vpop.xlane.xlu0 %1203 }
 0x308   :  { %v1201_v55 = vpop.xlane.xlu1 %1200  ;;  %3962 = vrcp.f32 %v1204_v63 }
 0x309   :  { %3964 = vrcp.f32 %v1201_v55 }
 0x30c   :  { %v1207_v61 = vpop.xlane.xlu1 %1206 }
 0x30d   :  { %3966 = vrcp.f32 %v1207_v61 }
 0x311   :  { %v3961_v56 = vpop.eup %3960 }
 0x312   :  { %v1212_v19 = vmul.f32 %v3961_v56, %v1198_v52 }
 0x314   :  { %v1216_v10 = vsub.f32 2.0, %v1212_v19 }
 0x315   :  { %v3963_v57 = vpop.eup %3962 }
 0x316   :  { %v3965_v9 = vpop.eup %3964  ;;  %v1220_v58 = vmul.f32 %v3961_v56, %v1216_v10  ;;  %v1214_v59 = vmul.f32 %v3963_v57, %v1204_v63 }
 0x317   :  { %v1213_v54 = vmul.f32 %v3965_v9, %v1201_v55 }
 0x318   :  { %v1224_v51 = vmul.f32 %v3953_v60, %v1220_v58  ;;  %v1218_v50 = vsub.f32 2.0, %v1214_v59  ;;  %v4598_v60 = vld [vmem:[%s4863_s5 + $0x8] sm:$0xff] }
 0x319   :  { %v1217_v47 = vsub.f32 2.0, %v1213_v54  ;;  %v4945_v54 = vld [vmem:[#allocation26_spill] sm:$0xff] }
 0x31a   :  { %v3967_v48 = vpop.eup %3966  ;;  %v1222_v45 = vmul.f32 %v3963_v57, %v1218_v50  ;;  %3741 = vmatprep.mubr.msk.f32.mxu1 %vm41_vm0, %v1224_v51  ;;  %v4944_v57 = vld [vmem:[#allocation25_spill] sm:$0xff] }
 0x31b   :  { %v1221_v46 = vmul.f32 %v3965_v9, %v1217_v47  ;;  %v1215_v44 = vmul.f32 %v3967_v48, %v1207_v61  ;;  %v4943_v61 = vld [vmem:[#allocation24_spill] sm:$0xff] }
 0x31c   :  { %v1226_v43 = vmul.f32 %v3955_v62, %v1222_v45 }
 0x31d   :  { %v1225_v41 = vmul.f32 %v3957_v2, %v1221_v46  ;;  %v1219_v42 = vsub.f32 2.0, %v1215_v44  ;;  %v4941_v46 = vld [vmem:[#allocation22_spill] sm:$0xff] }
 0x31f   :  { %v1223_v39 = vmul.f32 %v3967_v48, %v1219_v42  ;;  %3742 = vmatmul.mubr.msk.f32.vlgmr.msra.gmra.mxu1 %vm41_vm0, %v1225_v41  ;;  %v4605_v41 = vld [vmem:[%s4863_s5] sm:$0xff] }
 0x320   :  { %3744 = vmatprep.mubr.msk.f32.mxu1 %vm41_vm0, %v1226_v43  ;;  %3748 = vmatpush3.msra.mxu1 %v4598_v60  ;;  %v4615_v43 = vld [vmem:[%s4863_s5 + $0x18] sm:$0xff] }
 0x321   :  { %v1227_v52 = vmul.f32 %v3959_v49, %v1223_v39  ;;  %3752 = vmatprep.subr.mxu1 %v4921_v53  ;;  %v4942_v49 = vld [vmem:[#allocation23_spill] sm:$0xff] }
 0x323   :  { %3745 = vmatmul.mubr.msk.f32.gmra.mxu1 %vm41_vm0, %v1227_v52 }
 0x324   :  { %3749 = vmatprep.mubr.msk.f32.mxu1 %vm4007_vm1, %v4921_v53 }
 0x3df   :  { %v3743_v39 = vpop.f32.mrf.mxu1 }
 0x3e0   :  { %3750 = vmatmul.mubr.msk.f32.vlgmr.msra.gmra.mxu1 %vm115_vm2, %v3743_v39  ;;  %v4946_v39 = vld [vmem:[#allocation27_spill] sm:$0xff] }
 0x3e1   :  { %v1306_v42 = vpop.f32.mrf.mxu1  ;;  %3753 = vmatpush3.msra.mxu1 %v4605_v41  ;;  %3754 = vmatprep.mubr.msk.f32.mxu1 %vm4007_vm1, %v4921_v53 }
 0x3e2   :  { %3762 = vmatprep.subr.mxu1 %v4921_v53 }
 0x3e3   :  { %v3746_v44 = vpop.f32.mrf.mxu1 }
 0x3e4   :  { %3755 = vmatmul.mubr.msk.f32.vlgmr.msra.gmra.mxu1 %vm115_vm2, %v1306_v42 }
 0x3e5   :  { %v1316_v45 = vpop.f32.mrf.mxu1  ;;  %3763 = vmatpush3.msra.mxu1 %v4615_v43  ;;  %3764 = vmatprep.mubr.msk.f32.mxu1 %vm4007_vm1, %v4921_v53 }
 0x3e6   :  { %3760 = vmatmul.mubr.msk.f32.vlgmr.msra.gmra.mxu0 %vm115_vm2, %v1316_v45  ;;  %3778 = vmatprep.subr.mxu1 %v4921_v53 }
 0x3e7   :  { %3768 = vmatpush3.msra.mxu0 %v4054_v0  ;;  %3775 = vmatprep.mubr.msk.f32.mxu0 %vm4007_vm1, %v4921_v53  ;;  %v4637_v0 = vld [vmem:[%s4858_s0 + $0x8] sm:$0xff] }
 0x3e8   :  { %3769 = vmatprep.subr.mxu0 %v4921_v53  ;;  %3765 = vmatmul.mubr.msk.f32.vlgmr.msra.gmra.mxu1 %vm115_vm2, %v3746_v44 }
 0x3e9   :  { %3770 = vmatpush3.msra.mxu0 %v4066_v3  ;;  %3779 = vmatpush3.msra.mxu1 %v4059_v1  ;;  %v4651_v1 = vld [vmem:[%s4859_s1 + $0x8] sm:$0xff] }
 0x3ea   :  { %3771 = vmatprep.subr.mxu0 %v4921_v53  ;;  %3780 = vmatprep.subr.mxu1 %v4921_v53  ;;  %v4670_v3 = vld [vmem:[%s4860_s2 + $0x8] sm:$0xff]  ;;  %s4008_s2 = smov [#allocation5]  }
 0x3eb   :  { %3772 = vmatpush3.msra.mxu0 %v4080_v5  ;;  %3781 = vmatpush3.msra.mxu1 %v4071_v4  ;;  %v4927_v4 = vld [vmem:[#allocation8_spill] sm:$0xff]  ;;  %v4928_v5 = vld [vmem:[#allocation10_spill] sm:$0xff]  ;;  %s3209_s27 = sshll.u32 %s4008_s2, 4  ;;  %s3210_s27 = int_to_ptr.vmem [resolvable:$true] %s3209_s27 }
 0x3ec   :  { %3773 = vmatprep.subr.mxu0 %v4921_v53  ;;  %3782 = vmatprep.subr.mxu1 %v4921_v53  ;;  %s3984_s28 = scalar_lea.vmem %s3210_s27, 256  ;;  %p3989_p1 = scmp.lt.s32.totalorder %s3210_s27, %s3210_s27 }
 0x3ed   :  { %3774 = vmatpush3.msra.mxu0 %v4094_v7  ;;  %3783 = vmatpush3.msra.mxu1 %v4085_v6  ;;  %v4929_v6 = vld [vmem:[#allocation9_spill] sm:$0xff]  ;;  %v4930_v7 = vld [vmem:[#allocation11_spill] sm:$0xff]  ;;  %p3985_p0 = scmp.ne.s32.totalorder %s3210_s27, %s3984_s28  ;;  %p3990_p2 = scmp.lt.s32.totalorder %s3984_s28, %s3984_s28 }
 0x3ee   :  { %3776 = vmatmul.mubr.msk.f32.vlgmr.msra.gmra.mxu0 %vm41_vm0, %v4637_v0  ;;  %3784 = vmatprep.subr.mxu1 %v4921_v53 }
 0x3ef   :  { %3789 = vmatprep.subr.mxu0 %v4921_v53  ;;  %3785 = vmatpush3.msra.mxu1 %v4101_v8  ;;  %v4931_v8 = vld [vmem:[#allocation12_spill] sm:$0xff]  ;;  %p3991_p3 = por %p3990_p2, %p3989_p1 }
 0x3f0   :  { %3790 = vmatpush3.msra.mxu0 %v4124_v11  ;;  %3786 = vmatprep.mubr.msk.f32.mxu1 %vm4007_vm1, %v4921_v53  ;;  %v4932_v11 = vld [vmem:[#allocation14_spill] sm:$0xff] }
 0x3f1   :  { %3791 = vmatprep.subr.mxu0 %v4921_v53  ;;  %3800 = vmatprep.subr.mxu1 %v4921_v53  ;;  %p3992_p4 = pnand %p3991_p3, %p3985_p0 }
 0x3f2   :  { %3787 = vmatmul.mubr.msk.f32.vlgmr.msra.gmra.mxu1 %vm41_vm0, %v4651_v1  ;;  %3792 = vmatpush3.msra.mxu0 %v4140_v13  ;;  %v4934_v13 = vld [vmem:[#allocation16_spill] sm:$0xff] }
 0x3f3   :  { %3801 = vmatpush3.msra.mxu1 %v4129_v12  ;;  %3793 = vmatprep.subr.mxu0 %v4921_v53  ;;  %v4933_v12 = vld [vmem:[#allocation13_spill] sm:$0xff] }
 0x3f4   :  { %3802 = vmatprep.subr.mxu1 %v4921_v53  ;;  %3794 = vmatpush3.msra.mxu0 %v4154_v15  ;;  %v4936_v15 = vld [vmem:[#allocation18_spill] sm:$0xff] }
 0x3f5   :  { %3803 = vmatpush3.msra.mxu1 %v4145_v14  ;;  %3795 = vmatprep.subr.mxu0 %v4921_v53  ;;  %v4935_v14 = vld [vmem:[#allocation15_spill] sm:$0xff] }
 0x3f6   :  { %3804 = vmatprep.subr.mxu1 %v4921_v53  ;;  %3796 = vmatpush3.msra.mxu0 %v4168_v17  ;;  %v4938_v17 = vld [vmem:[#allocation19_spill] sm:$0xff] }
 0x3f7   :  { %3797 = vmatprep.mubr.msk.f32.mxu0 %vm4007_vm1, %v4921_v53  ;;  %3805 = vmatpush3.msra.mxu1 %v4159_v16  ;;  %v4937_v16 = vld [vmem:[#allocation17_spill] sm:$0xff] }
 0x3f8   :  { %3798 = vmatmul.mubr.msk.f32.vlgmr.msra.gmra.mxu0 %vm41_vm0, %v4670_v3  ;;  %3806 = vmatprep.subr.mxu1 %v4921_v53 }
 0x3f9   :  { %3811 = vmatprep.subr.mxu0 %v4921_v53  ;;  %3807 = vmatpush3.msra.mxu1 %v4175_v18 }
 0x3fa   :  { %3812 = vmatpush3.msra.mxu0 %v4193_v20  ;;  %3808 = vmatprep.mubr.msk.f32.mxu1 %vm4007_vm1, %v4921_v53 }
 0x3fb   :  { %3813 = vmatprep.subr.mxu0 %v4921_v53  ;;  %3822 = vmatprep.subr.mxu1 %v4921_v53 }
 0x3fc   :  { %3809 = vmatmul.mubr.msk.f32.vlgmr.msra.gmra.mxu1 %vm41_vm0, %v4637_v0  ;;  %3814 = vmatpush3.msra.mxu0 %v4209_v22 }
 0x3fd   :  { %3823 = vmatpush3.msra.mxu1 %v4198_v21  ;;  %3815 = vmatprep.subr.mxu0 %v4921_v53 }
 0x3fe   :  { %3824 = vmatprep.subr.mxu1 %v4921_v53  ;;  %3816 = vmatpush3.msra.mxu0 %v4223_v24 }
 0x3ff   :  { %3825 = vmatpush3.msra.mxu1 %v4214_v23  ;;  %3817 = vmatprep.subr.mxu0 %v4921_v53 }
 0x400   :  { %3826 = vmatprep.subr.mxu1 %v4921_v53  ;;  %3818 = vmatpush3.msra.mxu0 %v4237_v26 }
 0x401   :  { %3819 = vmatprep.mubr.msk.f32.mxu0 %vm4007_vm1, %v4921_v53  ;;  %3827 = vmatpush3.msra.mxu1 %v4228_v25 }
 0x402   :  { %3820 = vmatmul.mubr.msk.f32.vlgmr.msra.gmra.mxu0 %vm41_vm0, %v4651_v1  ;;  %3828 = vmatprep.subr.mxu1 %v4921_v53 }
 0x403   :  { %3833 = vmatprep.subr.mxu0 %v4921_v53  ;;  %3829 = vmatpush3.msra.mxu1 %v4244_v27 }
 0x404   :  { %3834 = vmatpush3.msra.mxu0 %v4257_v28  ;;  %3830 = vmatprep.mubr.msk.f32.mxu1 %vm4007_vm1, %v4921_v53 }
 0x405   :  { %3835 = vmatprep.subr.mxu0 %v4921_v53  ;;  %3844 = vmatprep.subr.mxu1 %v4921_v53 }
 0x406   :  { %3831 = vmatmul.mubr.msk.f32.vlgmr.msra.gmra.mxu1 %vm41_vm0, %v4670_v3  ;;  %3836 = vmatpush3.msra.mxu0 %v4273_v30 }
 0x407   :  { %3845 = vmatpush3.msra.mxu1 %v4262_v29  ;;  %3837 = vmatprep.subr.mxu0 %v4921_v53 }
 0x408   :  { %3846 = vmatprep.subr.mxu1 %v4921_v53  ;;  %3838 = vmatpush3.msra.mxu0 %v4287_v32 }
 0x409   :  { %3847 = vmatpush3.msra.mxu1 %v4278_v31  ;;  %3839 = vmatprep.subr.mxu0 %v4921_v53  ;;  %v4939_v31 = vld [vmem:[#allocation20_spill] sm:$0xff] }
 0x40a   :  { %3848 = vmatprep.subr.mxu1 %v4921_v53  ;;  %3840 = vmatpush3.msra.mxu0 %v4301_v34 }
 0x40b   :  { %3841 = vmatprep.mubr.msk.f32.mxu0 %vm4007_vm1, %v4921_v53  ;;  %3849 = vmatpush3.msra.mxu1 %v4292_v33 }
 0x40c   :  { %3842 = vmatmul.mubr.msk.f32.vlgmr.msra.gmra.mxu0 %vm41_vm0, %v4637_v0  ;;  %3850 = vmatprep.subr.mxu1 %v4921_v53 }
 0x40d   :  { %3855 = vmatprep.subr.mxu0 %v4921_v53  ;;  %3851 = vmatpush3.msra.mxu1 %v4308_v35  ;;  %v4940_v35 = vld [vmem:[#allocation21_spill] sm:$0xff] }
 0x40e   :  { %3856 = vmatpush3.msra.mxu0 %v4321_v36  ;;  %3852 = vmatprep.mubr.msk.f32.mxu1 %vm4007_vm1, %v4921_v53 }
 0x40f   :  { %3857 = vmatprep.subr.mxu0 %v4921_v53  ;;  %3866 = vmatprep.subr.mxu1 %v4921_v53 }
 0x410   :  { %3853 = vmatmul.mubr.msk.f32.vlgmr.msra.gmra.mxu1 %vm41_vm0, %v4651_v1  ;;  %3858 = vmatpush3.msra.mxu0 %v4337_v38 }
 0x411   :  { %3867 = vmatpush3.msra.mxu1 %v4326_v37  ;;  %3859 = vmatprep.subr.mxu0 %v4921_v53 }
 0x412   :  { %3868 = vmatprep.subr.mxu1 %v4921_v53  ;;  %3860 = vmatpush3.msra.mxu0 %v4351_v40 }
 0x413   :  { %3869 = vmatpush3.msra.mxu1 %v4927_v4  ;;  %3861 = vmatprep.subr.mxu0 %v4921_v53 }
 0x414   :  { %3870 = vmatprep.subr.mxu1 %v4921_v53  ;;  %3862 = vmatpush3.msra.mxu0 %v4928_v5  ;;  %v4948_v5 = vld [vmem:[#allocation29_spill] sm:$0xff] }
 0x415   :  { %3863 = vmatprep.mubr.msk.f32.mxu0 %vm4007_vm1, %v4921_v53  ;;  %3871 = vmatpush3.msra.mxu1 %v4929_v6 }
 0x416   :  { %3864 = vmatmul.mubr.msk.f32.vlgmr.msra.gmra.mxu0 %vm41_vm0, %v4670_v3  ;;  %3872 = vmatprep.subr.mxu1 %v4921_v53 }
 0x417   :  { %3877 = vmatprep.subr.mxu0 %v4921_v53  ;;  %3873 = vmatpush3.msra.mxu1 %v4930_v7 }
 0x418   :  { %3878 = vmatpush3.msra.mxu0 %v4931_v8  ;;  %3874 = vmatprep.mubr.msk.f32.mxu1 %vm4007_vm1, %v4921_v53 }
 0x419   :  { %3879 = vmatprep.subr.mxu0 %v4921_v53  ;;  %3888 = vmatprep.subr.mxu1 %v4921_v53 }
 0x41a   :  { %3875 = vmatmul.mubr.msk.f32.vlgmr.msra.gmra.mxu1 %vm41_vm0, %v4637_v0  ;;  %3880 = vmatpush3.msra.mxu0 %v4932_v11  ;;  %v4947_v0 = vld [vmem:[#allocation28_spill] sm:$0xff]  ;;  %v4949_v11 = vld [vmem:[#allocation30_spill] sm:$0xff] }
 0x41b   :  { %3889 = vmatpush3.msra.mxu1 %v4933_v12  ;;  %3881 = vmatprep.subr.mxu0 %v4921_v53 }
 0x41c   :  { %3890 = vmatprep.subr.mxu1 %v4921_v53  ;;  %3882 = vmatpush3.msra.mxu0 %v4934_v13 }
 0x41d   :  { %3891 = vmatpush3.msra.mxu1 %v4935_v14  ;;  %3883 = vmatprep.subr.mxu0 %v4921_v53 }
 0x41e   :  { %3892 = vmatprep.subr.mxu1 %v4921_v53  ;;  %3884 = vmatpush3.msra.mxu0 %v4936_v15  ;;  %v4950_v15 = vld [vmem:[#allocation31_spill] sm:$0xff] }
 0x41f   :  { %3885 = vmatprep.mubr.msk.f32.mxu0 %vm4007_vm1, %v4921_v53  ;;  %3893 = vmatpush3.msra.mxu1 %v4937_v16 }
 0x420   :  { %3886 = vmatmul.mubr.msk.f32.vlgmr.msra.gmra.mxu0 %vm41_vm0, %v4651_v1  ;;  %3894 = vmatprep.subr.mxu1 %v4921_v53 }
 0x421   :  { %3895 = vmatpush3.msra.mxu1 %v4938_v17  ;;  %3896 = vmatprep.mubr.msk.f32.mxu1 %vm4007_vm1, %v4921_v53 }
 0x422   :  { %3897 = vmatmul.mubr.msk.f32.vlgmr.msra.gmra.mxu1 %vm41_vm0, %v4670_v3 }
 0x4a0   :  { %v1397_v18 = vpop.f32.mrf.mxu1 }
 0x4a2   :  { %v3751_v20 = vpop.f32.mrf.mxu1 }
 0x4a4   :  { %v1470_v21 = vpop.f32.mrf.mxu1 }
 0x4a5   :  { %v1471_v22 = vadd.f32 %v1470_v21, %v1397_v18 }
 0x4a6   :  { %v3756_v23 = vpop.f32.mrf.mxu1  ;;  %v1545_v24 = vpop.f32.mrf.mxu0 }
 0x4a7   :  { %v1549_v25 = vadd.f32 %v1545_v24, %v1471_v22 }
 0x4a8   :  { %v3761_v26 = vpop.f32.mrf.mxu0  ;;  %v1621_v27 = vpop.f32.mrf.mxu1 }
 0x4a9   :  { %v1625_v28 = vadd.f32 %v1621_v27, %v1549_v25 }
 0x4aa   :  { %v3766_v29 = vpop.f32.mrf.mxu1 }
 0x4ab   :  { %1626 = vst.msk [vmem:[#allocation5] sm:$0xff] %vm41_vm0, %v1625_v28 }
 0x4ae   :  { %v1713_v30 = vpop.f32.mrf.mxu0 }
 0x4af   :  { %v1714_v32 = vadd.f32 %v4939_v31, %v1713_v30  ;;  %v4951_v30 = vld [vmem:[#allocation36_spill] sm:$0xff] }
 0x4b0   :  { %v3777_v33 = vpop.f32.mrf.mxu0 }
 0x4b1   :  { %1717 = vst.msk [vmem:[#allocation2] sm:$0xff] %vm115_vm2, %v1714_v32  ;;  %v4952_v32 = vld [vmem:[#allocation33_spill] sm:$0xff] }
 0x4b2   :  { %v1798_v34 = vpop.f32.mrf.mxu1 }
 0x4b3   :  { %v1799_v36 = vadd.f32 %v4940_v35, %v1798_v34  ;;  %v4953_v35 = vld [vmem:[#allocation32_spill] sm:$0xff] }
 0x4b4   :  { %v3788_v37 = vpop.f32.mrf.mxu1 }
 0x4b5   :  { %1802 = vst.msk [vmem:[#allocation3] sm:$0xff] %vm115_vm2, %v1799_v36 }
 0x4b8   :  { %v1883_v38 = vpop.f32.mrf.mxu0  ;;  %v2626_v40 = vld [vmem:[#allocation2] sm:$0xff] }
 0x4b9   :  { %v1884_v48 = vadd.f32 %v4941_v46, %v1883_v38  ;;  %3907 = vmatprep.mubr.msk.f32.mxu0 %vm115_vm2, %v2626_v40  ;;  %v4954_v40 = vld [vmem:[#allocation35_spill] sm:$0xff] }
 0x4ba   :  { %v3799_v62 = vpop.f32.mrf.mxu0 }
 0x4bb   :  { %1887 = vst.msk [vmem:[#allocation4] sm:$0xff] %vm115_vm2, %v1884_v48 }
 0x4bc   :  { %v1965_v2 = vpop.f32.mrf.mxu1  ;;  %v2630_v26 = vld [vmem:[#allocation3] sm:$0xff] }
 0x4bd   :  { %v1966_v47 = vadd.f32 %v4942_v49, %v1965_v2  ;;  %v4955_v2 = vld [vmem:[#allocation34_spill] sm:$0xff] }
 0x4be   :  { %v3810_v63 = vpop.f32.mrf.mxu1 }
 0x4bf   :  { %1969 = vst.msk [vmem:[#allocation2 + $0x8] sm:$0xff] %vm115_vm2, %v1966_v47 }
 0x4c2   :  { %v2047_v55 = vpop.f32.mrf.mxu0  ;;  %v2634_v25 = vld [vmem:[#allocation4] sm:$0xff] }
 0x4c3   :  { %v2048_v56 = vadd.f32 %v4943_v61, %v2047_v55 }
 0x4c4   :  { %v3821_v19 = vpop.f32.mrf.mxu0 }
 0x4c5   :  { %2051 = vst.msk [vmem:[#allocation3 + $0x8] sm:$0xff] %vm115_vm2, %v2048_v56 }
 0x4c6   :  { %v2129_v10 = vpop.f32.mrf.mxu1  ;;  %v2627_v27 = vld [vmem:[#allocation2 + $0x8] sm:$0xff] }
 0x4c7   :  { %v2130_v9 = vadd.f32 %v4944_v57, %v2129_v10 }
 0x4c8   :  { %v3832_v58 = vpop.f32.mrf.mxu1 }
 0x4c9   :  { %2133 = vst.msk [vmem:[#allocation4 + $0x8] sm:$0xff] %vm115_vm2, %v2130_v9 }
 0x4cc   :  { %v2211_v59 = vpop.f32.mrf.mxu0  ;;  %v2631_v23 = vld [vmem:[#allocation3 + $0x8] sm:$0xff] }
 0x4cd   :  { %v2212_v51 = vadd.f32 %v4945_v54, %v2211_v59 }
 0x4ce   :  { %v3843_v50 = vpop.f32.mrf.mxu0 }
 0x4cf   :  { %2215 = vst.msk [vmem:[#allocation2 + $0x10] sm:$0xff] %vm115_vm2, %v2212_v51 }
 0x4d0   :  { %v2293_v52 = vpop.f32.mrf.mxu1  ;;  %v2635_v24 = vld [vmem:[#allocation4 + $0x8] sm:$0xff] }
 0x4d1   :  { %v2294_v42 = vadd.f32 %v4946_v39, %v2293_v52 }
 0x4d2   :  { %v3854_v44 = vpop.f32.mrf.mxu1 }
 0x4d3   :  { %2297 = vst.msk [vmem:[#allocation3 + $0x10] sm:$0xff] %vm115_vm2, %v2294_v42 }
 0x4d6   :  { %v2375_v45 = vpop.f32.mrf.mxu0  ;;  %v2628_v28 = vld [vmem:[#allocation2 + $0x10] sm:$0xff] }
 0x4d7   :  { %v2376_v1 = vadd.f32 %v4947_v0, %v2375_v45 }
 0x4d8   :  { %v3865_v3 = vpop.f32.mrf.mxu0 }
 0x4d9   :  { %2379 = vst.msk [vmem:[#allocation4 + $0x10] sm:$0xff] %vm115_vm2, %v2376_v1 }
 0x4da   :  { %v2457_v4 = vpop.f32.mrf.mxu1  ;;  %v2632_v20 = vld [vmem:[#allocation3 + $0x10] sm:$0xff] }
 0x4db   :  { %v2458_v6 = vadd.f32 %v4948_v5, %v2457_v4 }
 0x4dc   :  { %v3876_v7 = vpop.f32.mrf.mxu1 }
 0x4dd   :  { %2461 = vst.msk [vmem:[#allocation2 + $0x18] sm:$0xff] %vm115_vm2, %v2458_v6 }
 0x4e0   :  { %v2539_v8 = vpop.f32.mrf.mxu0  ;;  %v2636_v22 = vld [vmem:[#allocation4 + $0x10] sm:$0xff] }
 0x4e1   :  { %v2540_v12 = vadd.f32 %v4949_v11, %v2539_v8 }
 0x4e2   :  { %v3887_v13 = vpop.f32.mrf.mxu0  ;;  %v2621_v14 = vpop.f32.mrf.mxu1 }
 0x4e3   :  { %2543 = vst.msk [vmem:[#allocation3 + $0x18] sm:$0xff] %vm115_vm2, %v2540_v12  ;;  %v2622_v16 = vadd.f32 %v4950_v15, %v2621_v14 }
 0x4e4   :  { %v3898_v17 = vpop.f32.mrf.mxu1  ;;  %v2629_v29 = vld [vmem:[#allocation2 + $0x18] sm:$0xff] }
 0x4e5   :  { %2625 = vst.msk [vmem:[#allocation4 + $0x18] sm:$0xff] %vm115_vm2, %v2622_v16 }
 0x4ea   :  { %v2633_v18 = vld [vmem:[#allocation3 + $0x18] sm:$0xff] }
 0x4eb   :  { %3899 = vmatprep.subr.msk.mxu0 %vm115_vm2, %v2633_v18 }
 0x4ec   :  { %3900 = vmatpush3.xpose.msk.msra.mxu0 %vm115_vm2, %v2633_v18  ;;  %v2637_v21 = vld [vmem:[#allocation4 + $0x18] sm:$0xff] }
 0x4ed   :  { %3913 = vmatprep.subr.mxu1 %v2637_v21  ;;  %3901 = vmatprep.subr.msk.mxu0 %vm115_vm2, %v2632_v20 }
 0x4ee   :  { %3914 = vmatpush3.msra.mxu1 %v2637_v21 }
 0x4ef   :  { %3915 = vmatprep.subr.mxu1 %v2636_v22 }
 0x4f0   :  { %3902 = vmatpush3.xpose.msk.msra.mxu0 %vm115_vm2, %v2632_v20  ;;  %3916 = vmatpush3.msra.mxu1 %v2636_v22 }
 0x4f1   :  { %3903 = vmatprep.subr.msk.mxu0 %vm115_vm2, %v2631_v23  ;;  %3917 = vmatprep.subr.mxu1 %v2635_v24 }
 0x4f2   :  { %3918 = vmatpush3.msra.mxu1 %v2635_v24 }
 0x4f3   :  { %3919 = vmatprep.subr.mxu1 %v2634_v25 }
 0x4f4   :  { %3904 = vmatpush3.xpose.msk.msra.mxu0 %vm115_vm2, %v2631_v23  ;;  %3920 = vmatpush3.msra.mxu1 %v2634_v25 }
 0x4f5   :  { %3905 = vmatprep.subr.msk.mxu0 %vm115_vm2, %v2630_v26  ;;  %3927 = vmatprep.subr.mxu1 %v4921_v53 }
 0x4f8   :  { %3906 = vmatpush3.xpose.msk.msra.mxu0 %vm115_vm2, %v2630_v26 }
 0x4f9   :  { %3937 = vmatprep.subr.mxu0 %v4921_v53 }
 0x4fb   :  { %3908 = vmatmul.mubr.msk.f32.vlgmr.msra.gmra.mxu0 %vm115_vm2, %v2627_v27 }
 0x4fc   :  { %3910 = vmatprep.mubr.msk.f32.mxu0 %vm115_vm2, %v2628_v28  ;;  %3938 = vmatpush3.msra.mxu0 %v4951_v30 }
 0x4ff   :  { %3911 = vmatmul.mubr.msk.f32.gmra.mxu0 %vm115_vm2, %v2629_v29 }
 0x500   :  { %3939 = vmatprep.mubr.msk.f32.mxu0 %vm4007_vm1, %v4921_v53 }
 0x5bb   :  { %v3909_v31 = vpop.f32.mrf.mxu0 }
 0x5bc   :  { %v2738_v33 = vadd.f32 %v3909_v31, %v4952_v32 }
 0x5bd   :  { %v2732_v34 = vpop.f32.mrf.mxu0 }
 0x5be   :  { %v2733_v36 = vadd.f32 %v2732_v34, %v4953_v35  ;;  %v2754_v37 = vsel %vm41_vm0, %v2738_v33, -inf }
 0x5bf   :  { %2755 = vmax.xlane.f32.xlu1 %v2754_v37  ;;  %v3912_v38 = vpop.f32.mrf.mxu0 }
 0x5c0   :  { %v2748_v46 = vadd.f32 %v3912_v38, %v4954_v40  ;;  %v2751_v48 = vsel %vm41_vm0, %v2733_v36, -inf }
 0x5c1   :  { %2752 = vmax.xlane.f32.xlu0 %v2751_v48  ;;  %v2742_v62 = vpop.f32.mrf.mxu0 }
 0x5c2   :  { %v2743_v49 = vadd.f32 %v2742_v62, %v4955_v2  ;;  %v2760_v47 = vsel %vm41_vm0, %v2748_v46, -inf }
 0x5c3   :  { %2761 = vmax.xlane.f32.xlu1 %v2760_v47 }
 0x5c4   :  { %v2757_v63 = vsel %vm41_vm0, %v2743_v49, -inf }
 0x5c5   :  { %2758 = vmax.xlane.f32.xlu0 %v2757_v63 }
 0x648   :  { %v2756_v55 = vpop.xlane.xlu1 %2755 }
 0x649   :  { %v2764_v61 = vsub.f32 %v2738_v33, %v2756_v55 }
 0x64a   :  { %v2753_v56 = vpop.xlane.xlu0 %2752 }
 0x64b   :  { %v2769_v19 = vmul.f32 1.442695, %v2764_v61  ;;  %v2763_v10 = vsub.f32 %v2733_v36, %v2753_v56 }
 0x64c   :  { %v2762_v57 = vpop.xlane.xlu1 %2761 }
 0x64d   :  { %3968 = vpow2.f32 %v2769_v19  ;;  %v2767_v9 = vmul.f32 1.442695, %v2763_v10  ;;  %v2766_v58 = vsub.f32 %v2748_v46, %v2762_v57 }
 0x64e   :  { %v2759_v59 = vpop.xlane.xlu0 %2758 }
 0x64f   :  { %3970 = vpow2.f32 %v2767_v9  ;;  %v2773_v54 = vmul.f32 1.442695, %v2766_v58  ;;  %v2765_v51 = vsub.f32 %v2743_v49, %v2759_v59 }
 0x651   :  { %3972 = vpow2.f32 %v2773_v54  ;;  %v2771_v50 = vmul.f32 1.442695, %v2765_v51 }
 0x653   :  { %3974 = vpow2.f32 %v2771_v50 }
 0x65a   :  { %v3969_v52 = vpop.eup %3968 }
 0x65b   :  { %v2778_v39 = vsel %vm41_vm0, %v3969_v52, 0.0 }
 0x65c   :  { %v3971_v42 = vpop.eup %3970  ;;  %2779 = vadd.xlane.f32.xlu1 %v2778_v39 }
 0x65d   :  { %v2775_v44 = vsel %vm41_vm0, %v3971_v42, 0.0 }
 0x65e   :  { %v3973_v45 = vpop.eup %3972  ;;  %2776 = vadd.xlane.f32.xlu0 %v2775_v44 }
 0x65f   :  { %v2784_v0 = vsel %vm41_vm0, %v3973_v45, 0.0 }
 0x660   :  { %v3975_v1 = vpop.eup %3974  ;;  %2785 = vadd.xlane.f32.xlu1 %v2784_v0 }
 0x661   :  { %v2781_v3 = vsel %vm41_vm0, %v3975_v1, 0.0 }
 0x662   :  { %2782 = vadd.xlane.f32.xlu0 %v2781_v3 }
 0x6e5   :  { %v2780_v4 = vpop.xlane.xlu1 %2779 }
 0x6e6   :  { %3976 = vrcp.f32 %v2780_v4 }
 0x6e7   :  { %v2777_v5 = vpop.xlane.xlu0 %2776 }
 0x6e8   :  { %3978 = vrcp.f32 %v2777_v5 }
 0x6e9   :  { %v2786_v6 = vpop.xlane.xlu1 %2785 }
 0x6ea   :  { %3980 = vrcp.f32 %v2786_v6 }
 0x6eb   :  { %v2783_v7 = vpop.xlane.xlu0 %2782 }
 0x6ec   :  { %3982 = vrcp.f32 %v2783_v7 }
 0x6f3   :  { %v3977_v8 = vpop.eup %3976 }
 0x6f4   :  { %v2792_v11 = vmul.f32 %v3977_v8, %v2780_v4 }
 0x6f5   :  { %v3979_v12 = vpop.eup %3978 }
 0x6f6   :  { %v2796_v13 = vsub.f32 2.0, %v2792_v11  ;;  %v2791_v14 = vmul.f32 %v3979_v12, %v2777_v5 }
 0x6f7   :  { %v3981_v15 = vpop.eup %3980 }
 0x6f8   :  { %v2795_v16 = vsub.f32 2.0, %v2791_v14  ;;  %v2794_v17 = vmul.f32 %v3981_v15, %v2786_v6  ;;  %v2800_v20 = vmul.f32 %v3977_v8, %v2796_v13 }
 0x6f9   :  { %v3983_v18 = vpop.eup %3982 }
 0x6fa   :  { %v2799_v21 = vmul.f32 %v3979_v12, %v2795_v16  ;;  %v2798_v22 = vsub.f32 2.0, %v2794_v17  ;;  %v2793_v23 = vmul.f32 %v3983_v18, %v2783_v7  ;;  %v2804_v26 = vmul.f32 %v3969_v52, %v2800_v20 }
 0x6fc   :  { %v2803_v24 = vmul.f32 %v3971_v42, %v2799_v21  ;;  %v2797_v25 = vsub.f32 2.0, %v2793_v23  ;;  %v2802_v27 = vmul.f32 %v3981_v15, %v2798_v22 }
 0x6fe   :  { %v2801_v28 = vmul.f32 %v3983_v18, %v2797_v25  ;;  %3921 = vmatprep.mubr.msk.f32.mxu1 %vm41_vm0, %v2803_v24  ;;  %v2806_v30 = vmul.f32 %v3973_v45, %v2802_v27 }
 0x6ff   :  { %3922 = vmatmul.mubr.msk.f32.vlgmr.msra.gmra.mxu1 %vm41_vm0, %v2804_v26 }
 0x700   :  { %v2805_v29 = vmul.f32 %v3975_v1, %v2801_v28  ;;  %3928 = vmatpush3.msra.mxu1 %v4598_v60 }
 0x701   :  { %3932 = vmatprep.subr.mxu1 %v4921_v53 }
 0x702   :  { %3924 = vmatprep.mubr.msk.f32.mxu1 %vm41_vm0, %v2805_v29 }
 0x703   :  { %3925 = vmatmul.mubr.msk.f32.gmra.mxu1 %vm41_vm0, %v2806_v30 }
 0x704   :  { %3929 = vmatprep.mubr.msk.f32.mxu1 %vm4007_vm1, %v4921_v53 }
 0x7bf   :  { %v3923_v31 = vpop.f32.mrf.mxu1 }
 0x7c0   :  { %3930 = vmatmul.mubr.msk.f32.vlgmr.msra.gmra.mxu1 %vm115_vm2, %v3923_v31 }
 0x7c1   :  { %3933 = vmatpush3.msra.mxu1 %v4605_v41  ;;  %v2885_v32 = vpop.f32.mrf.mxu1  ;;  %3934 = vmatprep.mubr.msk.f32.mxu1 %vm4007_vm1, %v4921_v53 }
 0x7c2   :  { %3942 = vmatprep.subr.mxu1 %v4921_v53 }
 0x7c3   :  { %v3926_v60 = vpop.f32.mrf.mxu1 }
 0x7c4   :  { %3935 = vmatmul.mubr.msk.f32.vlgmr.msra.gmra.mxu1 %vm115_vm2, %v2885_v32 }
 0x7c5   :  { %3943 = vmatpush3.msra.mxu1 %v4615_v43  ;;  %v2895_v33 = vpop.f32.mrf.mxu1  ;;  %3944 = vmatprep.mubr.msk.f32.mxu1 %vm4007_vm1, %v4921_v53 }
 0x7c6   :  { %3940 = vmatmul.mubr.msk.f32.vlgmr.msra.gmra.mxu0 %vm115_vm2, %v2895_v33 }
 0x7c8   :  { %3945 = vmatmul.mubr.msk.f32.vlgmr.msra.gmra.mxu1 %vm115_vm2, %v3926_v60 }
 0x880   :  { %v2975_v41 = vpop.f32.mrf.mxu1 }
 0x882   :  { %v3931_v34 = vpop.f32.mrf.mxu1 }
 0x884   :  { %v3048_v35 = vpop.f32.mrf.mxu1 }
 0x885   :  { %v3049_v36 = vadd.f32 %v3048_v35, %v2975_v41 }
 0x886   :  { %v3936_v37 = vpop.f32.mrf.mxu1  ;;  %v3122_v38 = vpop.f32.mrf.mxu0 }
 0x887   :  { %v3126_v40 = vadd.f32 %v3122_v38, %v3049_v36 }
 0x888   :  { %v3941_v46 = vpop.f32.mrf.mxu0  ;;  %v3197_v48 = vpop.f32.mrf.mxu1 }
 0x889   :  { %v3201_v43 = vadd.f32 %v3197_v48, %v3126_v40 }
 0x88a   :  { %v3946_v62 = vpop.f32.mrf.mxu1 }
 0x88b   :  { %3203 = vst.msk [vmem:[#allocation5 + $0x8] sm:$0xff] %vm41_vm0, %v3201_v43 }
 0x88c   :  { %3995 = shalt.err (!%p3992_p4)
}
 0x88d   :  { %s4009_s29 = smov 128   ;;  %s4010_s30 = smov 8  }
 0x88e   :  { %3215 = dma.vmem_to_hbm [thread:$0]  %s3210_s27, 256, %s4865_s7, [#allocation6], %s4009_s29, %s4009_s29, %s4010_s30  }
 0x88f   :  { %4004 = dma.done.wait [#allocation6], 256  }
 0x890   :  { %4005 = vsyncadd [#allocation6], 4294967040 }
 0x891   :  { %3219 = vsyncpa [#allocation6], 1 }

</bundles_post_ra>
